<compile_context>
chip_gen: v7x
topology: tpu7x:2x2x1
jax: 0.10.0
libtpu: 0.0.40
codegen_flags: <defaults>
</compile_context>

<pallas_src>
import functools
import math

import numpy as np
import jax
import jax.numpy as jnp
from jax.experimental import pallas as pl
from jax.experimental.pallas import tpu as pltpu

_LN_EPS = 1e-5  # torch.nn.LayerNorm default


# ----------------------------- in-kernel math -----------------------------

def _erf(x):
    # Abramowitz & Stegun 7.1.26 rational approximation (|err| < 1.5e-7).
    a1, a2, a3, a4, a5 = (0.254829592, -0.284496736, 1.421413741,
                          -1.453152027, 1.061405429)
    p = 0.3275911
    s = jnp.where(x >= 0.0, 1.0, -1.0)
    z = jnp.abs(x)
    t = 1.0 / (1.0 + p * z)
    poly = ((((a5 * t + a4) * t + a3) * t + a2) * t + a1) * t
    return s * (1.0 - poly * jnp.exp(-z * z))


def _gelu(x):
    # Exact (erf-based) GELU, matching PyTorch F.gelu's default behaviour.
    return 0.5 * x * (1.0 + _erf(x * (1.0 / math.sqrt(2.0))))


def _layernorm(x, gamma, beta):
    mu = jnp.mean(x, axis=-1, keepdims=True)
    xc = x - mu
    var = jnp.mean(xc * xc, axis=-1, keepdims=True)
    return xc * jax.lax.rsqrt(var + _LN_EPS) * gamma + beta


# ------------------------------ Pallas kernel ------------------------------

def _encoder_block_kernel(x_ref,
                          wq_ref, bq_ref, wk_ref, bk_ref, wv_ref, bv_ref,
                          wo_ref, bo_ref,
                          w1_ref, b1_ref, w2_ref, b2_ref,
                          g1_ref, be1_ref, g2_ref, be2_ref,
                          out_ref, *, num_heads: int):
    x = x_ref[0]                         # (S, D) f32 for the current batch row
    S, D = x.shape
    hd = wq_ref.shape[2]
    scale = 1.0 / math.sqrt(hd)

    # ---- multi-head self-attention (per-head weight slabs, static unroll) ----
    attn_proj = jnp.zeros((S, D), jnp.float32)
    for h in range(num_heads):
        qh = jnp.dot(x, wq_ref[h], preferred_element_type=jnp.float32) + bq_ref[h]
        kh = jnp.dot(x, wk_ref[h], preferred_element_type=jnp.float32) + bk_ref[h]
        vh = jnp.dot(x, wv_ref[h], preferred_element_type=jnp.float32) + bv_ref[h]
        # scores[q, k] = <qh[q], kh[k]> / sqrt(hd)   (contraction on last dims)
        scores = jax.lax.dot_general(
            qh, kh, (((1,), (1,)), ((), ())),
            preferred_element_type=jnp.float32) * scale          # (S, S)
        scores = scores - jnp.max(scores, axis=-1, keepdims=True)
        p = jnp.exp(scores)
        attn = p / jnp.sum(p, axis=-1, keepdims=True)            # softmax
        oh = jnp.dot(attn, vh, preferred_element_type=jnp.float32)     # (S, hd)
        # concat_h(oh) @ Wo  ==  sum_h oh @ Wo[h]   (avoids in-kernel concat)
        attn_proj = attn_proj + jnp.dot(oh, wo_ref[h],
                                        preferred_element_type=jnp.float32)
    attn_out = attn_proj + bo_ref[...]

    # ---- residual + LayerNorm 1 ----
    y1 = _layernorm(x + attn_out, g1_ref[...], be1_ref[...])

    # ---- MLP block: fc1 -> GELU -> fc2 ----
    h1 = _gelu(jnp.dot(y1, w1_ref[...], preferred_element_type=jnp.float32)
               + b1_ref[...])
    mlp_out = jnp.dot(h1, w2_ref[...], preferred_element_type=jnp.float32) \
        + b2_ref[...]

    # ---- residual + LayerNorm 2 ----
    out_ref[0] = _layernorm(y1 + mlp_out, g2_ref[...], be2_ref[...])


# -------------------------------- wrapper ----------------------------------

def _resident_spec(a):
    """Full-array block, constant index_map -> stays resident across grid steps."""
    nd = a.ndim
    return pl.BlockSpec(a.shape, lambda b, nd=nd: (0,) * nd)


def transformer_encoder_block(x, params, *, num_heads: int):
    """x: (B, S, D) f32. params: full (D,D)/(D,)-style weights (JAX x@W layout)."""
    B, S, D = x.shape
    hd = D // num_heads
    Hm = params["w1"].shape[1]

    # Per-head slabs so the kernel only indexes the leading (head) axis.
    def per_head_w(w):     # (D, D) -> (nH, D, hd) ;  W[:, h*hd:(h+1)*hd] == [h]
        return jnp.transpose(w.reshape(D, num_heads, hd), (1, 0, 2))

    def per_head_b(b):     # (D,) -> (nH, 1, hd)
        return b.reshape(num_heads, 1, hd)

    wq, bq = per_head_w(params["wq"]), per_head_b(params["bq"])
    wk, bk = per_head_w(params["wk"]), per_head_b(params["bk"])
    wv, bv = per_head_w(params["wv"]), per_head_b(params["bv"])
    wo = params["wo"].reshape(num_heads, hd, D)      # Wo[h*hd:(h+1)*hd, :] == [h]
    bo = params["bo"].reshape(1, D)
    w1, b1 = params["w1"], params["b1"].reshape(1, Hm)
    w2, b2 = params["w2"], params["b2"].reshape(1, D)
    g1, be1 = params["g1"].reshape(1, D), params["be1"].reshape(1, D)
    g2, be2 = params["g2"].reshape(1, D), params["be2"].reshape(1, D)

    args = (x.astype(jnp.float32),
            wq, bq, wk, bk, wv, bv, wo, bo, w1, b1, w2, b2, g1, be1, g2, be2)

    kernel = functools.partial(_encoder_block_kernel, num_heads=num_heads)
    in_specs = [pl.BlockSpec((1, S, D), lambda b: (b, 0, 0))]
    in_specs += [_resident_spec(a) for a in args[1:]]

    return pl.pallas_call(
        kernel,
        out_shape=jax.ShapeDtypeStruct((B, S, D), jnp.float32),
        grid=(B,),
        in_specs=in_specs,
        out_specs=pl.BlockSpec((1, S, D), lambda b: (b, 0, 0)),
        compiler_params=pltpu.CompilerParams(
            dimension_semantics=("parallel",)),
    )(*args)


# --------------------------- pure-JAX reference -----------------------------

def _reference(x, params, num_heads):
    B, S, D = x.shape
    hd = D // num_heads

    def lin(t, w, b):
        return t @ w + b

    def split(t):
        return t.reshape(B, S, num_heads, hd).transpose(0, 2, 1, 3)

    q = split(lin(x, params["wq"], params["bq"]))
    k = split(lin(x, params["wk"], params["bk"]))
    v = split(lin(x, params["wv"], params["bv"]))
    scores = jnp.einsum("bhqd,bhkd->bhqk", q, k) / math.sqrt(hd)
    attn = jax.nn.softmax(scores, axis=-1)
    o = jnp.einsum("bhqk,bhkd->bhqd", attn, v)
    o = o.transpose(0, 2, 1, 3).reshape(B, S, D)
    o = lin(o, params["wo"], params["bo"])

    def ln(t, g, b):
        mu = t.mean(-1, keepdims=True)
        var = ((t - mu) ** 2).mean(-1, keepdims=True)
        return (t - mu) * jax.lax.rsqrt(var + _LN_EPS) * g + b

    y1 = ln(x + o, params["g1"], params["be1"])
    h1 = jax.nn.gelu(lin(y1, params["w1"], params["b1"]), approximate=False)
    y2 = ln(y1 + lin(h1, params["w2"], params["b2"]), params["g2"], params["be2"])
    return y2


# ---------------------------------- main ------------------------------------

if __name__ == "__main__":
    B, S, D, NH, MH = 2, 8, 32, 4, 64   # batch, seq, embed_dim, heads, mlp_hidden

    key = jax.random.PRNGKey(0)
    keys = jax.random.split(key, 16)

    def w(k, shape, scale=0.1):
        return scale * jax.random.normal(k, shape, dtype=jnp.float32)

    params = dict(
        wq=w(keys[0], (D, D)),  bq=w(keys[1], (D,)),
        wk=w(keys[2], (D, D)),  bk=w(keys[3], (D,)),
        wv=w(keys[4], (D, D)),  bv=w(keys[5], (D,)),
        wo=w(keys[6], (D, D)),  bo=w(keys[7], (D,)),
        w1=w(keys[8], (D, MH)), b1=w(keys[9], (MH,)),
        w2=w(keys[10], (MH, D)), b2=w(keys[11], (D,)),
        g1=jnp.ones((D,), jnp.float32),  be1=jnp.zeros((D,), jnp.float32),
        g2=jnp.ones((D,), jnp.float32),  be2=jnp.zeros((D,), jnp.float32),
    )
    x = jax.random.normal(keys[12], (B, S, D), dtype=jnp.float32)

    out = transformer_encoder_block(x, params, num_heads=NH)
    jax.block_until_ready(out)

    ref = _reference(x, params, NH)
    np.testing.assert_allclose(np.asarray(out), np.asarray(ref),
                               atol=2e-4, rtol=2e-4)
    print("KERNEL_OK")
</pallas_src>

<mosaic_0001>
module attributes {stable_mosaic.version = 11 : i64} {
  func.func @_encoder_block_kernel(%arg0: i32, %arg1: memref<1x8x32xf32, #tpu.memory_space<vmem>>, %arg2: memref<4x32x8xf32, #tpu.memory_space<vmem>>, %arg3: memref<4x1x8xf32, #tpu.memory_space<vmem>>, %arg4: memref<4x32x8xf32, #tpu.memory_space<vmem>>, %arg5: memref<4x1x8xf32, #tpu.memory_space<vmem>>, %arg6: memref<4x32x8xf32, #tpu.memory_space<vmem>>, %arg7: memref<4x1x8xf32, #tpu.memory_space<vmem>>, %arg8: memref<4x8x32xf32, #tpu.memory_space<vmem>>, %arg9: memref<1x32xf32, #tpu.memory_space<vmem>>, %arg10: memref<32x64xf32, #tpu.memory_space<vmem>>, %arg11: memref<1x64xf32, #tpu.memory_space<vmem>>, %arg12: memref<64x32xf32, #tpu.memory_space<vmem>>, %arg13: memref<1x32xf32, #tpu.memory_space<vmem>>, %arg14: memref<1x32xf32, #tpu.memory_space<vmem>>, %arg15: memref<1x32xf32, #tpu.memory_space<vmem>>, %arg16: memref<1x32xf32, #tpu.memory_space<vmem>>, %arg17: memref<1x32xf32, #tpu.memory_space<vmem>>, %arg18: memref<1x8x32xf32, #tpu.memory_space<vmem>>) attributes {dimension_semantics = [#tpu.dimension_semantics<parallel>], iteration_bounds = array<i64: 2>, scalar_prefetch = 0 : i64, scratch_operands = 0 : i64, tpu.core_type = #tpu.core_type<tc>, window_params = [{transform_indices = @transform_0, window_bounds = array<i64: 1, 8, 32>}, {pipeline_mode = #tpu.pipeline_mode<synchronous>, transform_indices = @transform_1, window_bounds = array<i64: 4, 32, 8>}, {pipeline_mode = #tpu.pipeline_mode<synchronous>, transform_indices = @transform_2, window_bounds = array<i64: 4, 1, 8>}, {pipeline_mode = #tpu.pipeline_mode<synchronous>, transform_indices = @transform_3, window_bounds = array<i64: 4, 32, 8>}, {pipeline_mode = #tpu.pipeline_mode<synchronous>, transform_indices = @transform_4, window_bounds = array<i64: 4, 1, 8>}, {pipeline_mode = #tpu.pipeline_mode<synchronous>, transform_indices = @transform_5, window_bounds = array<i64: 4, 32, 8>}, {pipeline_mode = #tpu.pipeline_mode<synchronous>, transform_indices = @transform_6, window_bounds = array<i64: 4, 1, 8>}, {pipeline_mode = #tpu.pipeline_mode<synchronous>, transform_indices = @transform_7, window_bounds = array<i64: 4, 8, 32>}, {pipeline_mode = #tpu.pipeline_mode<synchronous>, transform_indices = @transform_8, window_bounds = array<i64: 1, 32>}, {pipeline_mode = #tpu.pipeline_mode<synchronous>, transform_indices = @transform_9, window_bounds = array<i64: 32, 64>}, {pipeline_mode = #tpu.pipeline_mode<synchronous>, transform_indices = @transform_10, window_bounds = array<i64: 1, 64>}, {pipeline_mode = #tpu.pipeline_mode<synchronous>, transform_indices = @transform_11, window_bounds = array<i64: 64, 32>}, {pipeline_mode = #tpu.pipeline_mode<synchronous>, transform_indices = @transform_12, window_bounds = array<i64: 1, 32>}, {pipeline_mode = #tpu.pipeline_mode<synchronous>, transform_indices = @transform_13, window_bounds = array<i64: 1, 32>}, {pipeline_mode = #tpu.pipeline_mode<synchronous>, transform_indices = @transform_14, window_bounds = array<i64: 1, 32>}, {pipeline_mode = #tpu.pipeline_mode<synchronous>, transform_indices = @transform_15, window_bounds = array<i64: 1, 32>}, {pipeline_mode = #tpu.pipeline_mode<synchronous>, transform_indices = @transform_16, window_bounds = array<i64: 1, 32>}, {transform_indices = @transform_17, window_bounds = array<i64: 1, 8, 32>}]} {
    %c0 = arith.constant 0 : index
    %c0_0 = arith.constant 0 : index
    %c0_1 = arith.constant 0 : index
    %0 = vector.load %arg1[%c0, %c0_0, %c0_1] : memref<1x8x32xf32, #tpu.memory_space<vmem>>, vector<1x8x32xf32>
    %1 = vector.shape_cast %0 : vector<1x8x32xf32> to vector<8x32xf32>
    %cst = arith.constant 0.000000e+00 : f32
    %2 = vector.broadcast %cst : f32 to vector<8x32xf32>
    %c0_2 = arith.constant 0 : index
    %c0_3 = arith.constant 0 : index
    %c0_4 = arith.constant 0 : index
    %3 = vector.load %arg2[%c0_2, %c0_3, %c0_4] : memref<4x32x8xf32, #tpu.memory_space<vmem>>, vector<1x32x8xf32>
    %4 = vector.shape_cast %3 : vector<1x32x8xf32> to vector<32x8xf32>
    %cst_5 = arith.constant dense<0.000000e+00> : vector<8x8xf32>
    %5 = tpu.matmul %1, %4, %cst_5 {dimension_numbers = #tpu.dot_dimension_numbers<[1], [0], [0], [1], [0, 0, 1, 1], [], []>} : vector<8x32xf32>, vector<32x8xf32>, vector<8x8xf32> -> vector<8x8xf32>
    %c0_6 = arith.constant 0 : index
    %c0_7 = arith.constant 0 : index
    %c0_8 = arith.constant 0 : index
    %6 = vector.load %arg3[%c0_6, %c0_7, %c0_8] : memref<4x1x8xf32, #tpu.memory_space<vmem>>, vector<1x1x8xf32>
    %7 = vector.shape_cast %6 : vector<1x1x8xf32> to vector<1x8xf32>
    %8 = vector.broadcast %7 : vector<1x8xf32> to vector<8x8xf32>
    %9 = arith.addf %5, %8 : vector<8x8xf32>
    %c0_9 = arith.constant 0 : index
    %c0_10 = arith.constant 0 : index
    %c0_11 = arith.constant 0 : index
    %10 = vector.load %arg4[%c0_9, %c0_10, %c0_11] : memref<4x32x8xf32, #tpu.memory_space<vmem>>, vector<1x32x8xf32>
    %11 = vector.shape_cast %10 : vector<1x32x8xf32> to vector<32x8xf32>
    %cst_12 = arith.constant dense<0.000000e+00> : vector<8x8xf32>
    %12 = tpu.matmul %1, %11, %cst_12 {dimension_numbers = #tpu.dot_dimension_numbers<[1], [0], [0], [1], [0, 0, 1, 1], [], []>} : vector<8x32xf32>, vector<32x8xf32>, vector<8x8xf32> -> vector<8x8xf32>
    %c0_13 = arith.constant 0 : index
    %c0_14 = arith.constant 0 : index
    %c0_15 = arith.constant 0 : index
    %13 = vector.load %arg5[%c0_13, %c0_14, %c0_15] : memref<4x1x8xf32, #tpu.memory_space<vmem>>, vector<1x1x8xf32>
    %14 = vector.shape_cast %13 : vector<1x1x8xf32> to vector<1x8xf32>
    %15 = vector.broadcast %14 : vector<1x8xf32> to vector<8x8xf32>
    %16 = arith.addf %12, %15 : vector<8x8xf32>
    %c0_16 = arith.constant 0 : index
    %c0_17 = arith.constant 0 : index
    %c0_18 = arith.constant 0 : index
    %17 = vector.load %arg6[%c0_16, %c0_17, %c0_18] : memref<4x32x8xf32, #tpu.memory_space<vmem>>, vector<1x32x8xf32>
    %18 = vector.shape_cast %17 : vector<1x32x8xf32> to vector<32x8xf32>
    %cst_19 = arith.constant dense<0.000000e+00> : vector<8x8xf32>
    %19 = tpu.matmul %1, %18, %cst_19 {dimension_numbers = #tpu.dot_dimension_numbers<[1], [0], [0], [1], [0, 0, 1, 1], [], []>} : vector<8x32xf32>, vector<32x8xf32>, vector<8x8xf32> -> vector<8x8xf32>
    %c0_20 = arith.constant 0 : index
    %c0_21 = arith.constant 0 : index
    %c0_22 = arith.constant 0 : index
    %20 = vector.load %arg7[%c0_20, %c0_21, %c0_22] : memref<4x1x8xf32, #tpu.memory_space<vmem>>, vector<1x1x8xf32>
    %21 = vector.shape_cast %20 : vector<1x1x8xf32> to vector<1x8xf32>
    %22 = vector.broadcast %21 : vector<1x8xf32> to vector<8x8xf32>
    %23 = arith.addf %19, %22 : vector<8x8xf32>
    %cst_23 = arith.constant dense<0.000000e+00> : vector<8x8xf32>
    %24 = tpu.matmul %9, %16, %cst_23 {dimension_numbers = #tpu.dot_dimension_numbers<[1], [1], [0], [0], [0, 0, 1, 0], [], []>} : vector<8x8xf32>, vector<8x8xf32>, vector<8x8xf32> -> vector<8x8xf32>
    %cst_24 = arith.constant 0.353553385 : f32
    %25 = vector.broadcast %cst_24 : f32 to vector<8x8xf32>
    %26 = arith.mulf %24, %25 : vector<8x8xf32>
    %cst_25 = arith.constant dense<0xFF800000> : vector<8xf32>
    %27 = vector.multi_reduction <maximumf>, %26, %cst_25 [1] : vector<8x8xf32> to vector<8xf32>
    %28 = vector.shape_cast %27 : vector<8xf32> to vector<8x1xf32>
    %29 = vector.broadcast %28 : vector<8x1xf32> to vector<8x8xf32>
    %30 = arith.subf %26, %29 : vector<8x8xf32>
    %31 = math.exp %30 : vector<8x8xf32>
    %cst_26 = arith.constant dense<0.000000e+00> : vector<8xf32>
    %32 = vector.multi_reduction <add>, %31, %cst_26 [1] : vector<8x8xf32> to vector<8xf32>
    %33 = vector.shape_cast %32 : vector<8xf32> to vector<8x1xf32>
    %34 = vector.broadcast %33 : vector<8x1xf32> to vector<8x8xf32>
    %35 = arith.divf %31, %34 : vector<8x8xf32>
    %cst_27 = arith.constant dense<0.000000e+00> : vector<8x8xf32>
    %36 = tpu.matmul %35, %23, %cst_27 {dimension_numbers = #tpu.dot_dimension_numbers<[1], [0], [0], [1], [0, 0, 1, 1], [], []>} : vector<8x8xf32>, vector<8x8xf32>, vector<8x8xf32> -> vector<8x8xf32>
    %c0_28 = arith.constant 0 : index
    %c0_29 = arith.constant 0 : index
    %c0_30 = arith.constant 0 : index
    %37 = vector.load %arg8[%c0_28, %c0_29, %c0_30] : memref<4x8x32xf32, #tpu.memory_space<vmem>>, vector<1x8x32xf32>
    %38 = vector.shape_cast %37 : vector<1x8x32xf32> to vector<8x32xf32>
    %cst_31 = arith.constant dense<0.000000e+00> : vector<8x32xf32>
    %39 = tpu.matmul %36, %38, %cst_31 {dimension_numbers = #tpu.dot_dimension_numbers<[1], [0], [0], [1], [0, 0, 1, 1], [], []>} : vector<8x8xf32>, vector<8x32xf32>, vector<8x32xf32> -> vector<8x32xf32>
    %40 = arith.addf %2, %39 : vector<8x32xf32>
    %c1 = arith.constant 1 : index
    %c0_32 = arith.constant 0 : index
    %c0_33 = arith.constant 0 : index
    %41 = vector.load %arg2[%c1, %c0_32, %c0_33] : memref<4x32x8xf32, #tpu.memory_space<vmem>>, vector<1x32x8xf32>
    %42 = vector.shape_cast %41 : vector<1x32x8xf32> to vector<32x8xf32>
    %cst_34 = arith.constant dense<0.000000e+00> : vector<8x8xf32>
    %43 = tpu.matmul %1, %42, %cst_34 {dimension_numbers = #tpu.dot_dimension_numbers<[1], [0], [0], [1], [0, 0, 1, 1], [], []>} : vector<8x32xf32>, vector<32x8xf32>, vector<8x8xf32> -> vector<8x8xf32>
    %c1_35 = arith.constant 1 : index
    %c0_36 = arith.constant 0 : index
    %c0_37 = arith.constant 0 : index
    %44 = vector.load %arg3[%c1_35, %c0_36, %c0_37] : memref<4x1x8xf32, #tpu.memory_space<vmem>>, vector<1x1x8xf32>
    %45 = vector.shape_cast %44 : vector<1x1x8xf32> to vector<1x8xf32>
    %46 = vector.broadcast %45 : vector<1x8xf32> to vector<8x8xf32>
    %47 = arith.addf %43, %46 : vector<8x8xf32>
    %c1_38 = arith.constant 1 : index
    %c0_39 = arith.constant 0 : index
    %c0_40 = arith.constant 0 : index
    %48 = vector.load %arg4[%c1_38, %c0_39, %c0_40] : memref<4x32x8xf32, #tpu.memory_space<vmem>>, vector<1x32x8xf32>
    %49 = vector.shape_cast %48 : vector<1x32x8xf32> to vector<32x8xf32>
    %cst_41 = arith.constant dense<0.000000e+00> : vector<8x8xf32>
    %50 = tpu.matmul %1, %49, %cst_41 {dimension_numbers = #tpu.dot_dimension_numbers<[1], [0], [0], [1], [0, 0, 1, 1], [], []>} : vector<8x32xf32>, vector<32x8xf32>, vector<8x8xf32> -> vector<8x8xf32>
    %c1_42 = arith.constant 1 : index
    %c0_43 = arith.constant 0 : index
    %c0_44 = arith.constant 0 : index
    %51 = vector.load %arg5[%c1_42, %c0_43, %c0_44] : memref<4x1x8xf32, #tpu.memory_space<vmem>>, vector<1x1x8xf32>
    %52 = vector.shape_cast %51 : vector<1x1x8xf32> to vector<1x8xf32>
    %53 = vector.broadcast %52 : vector<1x8xf32> to vector<8x8xf32>
    %54 = arith.addf %50, %53 : vector<8x8xf32>
    %c1_45 = arith.constant 1 : index
    %c0_46 = arith.constant 0 : index
    %c0_47 = arith.constant 0 : index
    %55 = vector.load %arg6[%c1_45, %c0_46, %c0_47] : memref<4x32x8xf32, #tpu.memory_space<vmem>>, vector<1x32x8xf32>
    %56 = vector.shape_cast %55 : vector<1x32x8xf32> to vector<32x8xf32>
    %cst_48 = arith.constant dense<0.000000e+00> : vector<8x8xf32>
    %57 = tpu.matmul %1, %56, %cst_48 {dimension_numbers = #tpu.dot_dimension_numbers<[1], [0], [0], [1], [0, 0, 1, 1], [], []>} : vector<8x32xf32>, vector<32x8xf32>, vector<8x8xf32> -> vector<8x8xf32>
    %c1_49 = arith.constant 1 : index
    %c0_50 = arith.constant 0 : index
    %c0_51 = arith.constant 0 : index
    %58 = vector.load %arg7[%c1_49, %c0_50, %c0_51] : memref<4x1x8xf32, #tpu.memory_space<vmem>>, vector<1x1x8xf32>
    %59 = vector.shape_cast %58 : vector<1x1x8xf32> to vector<1x8xf32>
    %60 = vector.broadcast %59 : vector<1x8xf32> to vector<8x8xf32>
    %61 = arith.addf %57, %60 : vector<8x8xf32>
    %cst_52 = arith.constant dense<0.000000e+00> : vector<8x8xf32>
    %62 = tpu.matmul %47, %54, %cst_52 {dimension_numbers = #tpu.dot_dimension_numbers<[1], [1], [0], [0], [0, 0, 1, 0], [], []>} : vector<8x8xf32>, vector<8x8xf32>, vector<8x8xf32> -> vector<8x8xf32>
    %cst_53 = arith.constant 0.353553385 : f32
    %63 = vector.broadcast %cst_53 : f32 to vector<8x8xf32>
    %64 = arith.mulf %62, %63 : vector<8x8xf32>
    %cst_54 = arith.constant dense<0xFF800000> : vector<8xf32>
    %65 = vector.multi_reduction <maximumf>, %64, %cst_54 [1] : vector<8x8xf32> to vector<8xf32>
    %66 = vector.shape_cast %65 : vector<8xf32> to vector<8x1xf32>
    %67 = vector.broadcast %66 : vector<8x1xf32> to vector<8x8xf32>
    %68 = arith.subf %64, %67 : vector<8x8xf32>
    %69 = math.exp %68 : vector<8x8xf32>
    %cst_55 = arith.constant dense<0.000000e+00> : vector<8xf32>
    %70 = vector.multi_reduction <add>, %69, %cst_55 [1] : vector<8x8xf32> to vector<8xf32>
    %71 = vector.shape_cast %70 : vector<8xf32> to vector<8x1xf32>
    %72 = vector.broadcast %71 : vector<8x1xf32> to vector<8x8xf32>
    %73 = arith.divf %69, %72 : vector<8x8xf32>
    %cst_56 = arith.constant dense<0.000000e+00> : vector<8x8xf32>
    %74 = tpu.matmul %73, %61, %cst_56 {dimension_numbers = #tpu.dot_dimension_numbers<[1], [0], [0], [1], [0, 0, 1, 1], [], []>} : vector<8x8xf32>, vector<8x8xf32>, vector<8x8xf32> -> vector<8x8xf32>
    %c1_57 = arith.constant 1 : index
    %c0_58 = arith.constant 0 : index
    %c0_59 = arith.constant 0 : index
    %75 = vector.load %arg8[%c1_57, %c0_58, %c0_59] : memref<4x8x32xf32, #tpu.memory_space<vmem>>, vector<1x8x32xf32>
    %76 = vector.shape_cast %75 : vector<1x8x32xf32> to vector<8x32xf32>
    %cst_60 = arith.constant dense<0.000000e+00> : vector<8x32xf32>
    %77 = tpu.matmul %74, %76, %cst_60 {dimension_numbers = #tpu.dot_dimension_numbers<[1], [0], [0], [1], [0, 0, 1, 1], [], []>} : vector<8x8xf32>, vector<8x32xf32>, vector<8x32xf32> -> vector<8x32xf32>
    %78 = arith.addf %40, %77 : vector<8x32xf32>
    %c2 = arith.constant 2 : index
    %c0_61 = arith.constant 0 : index
    %c0_62 = arith.constant 0 : index
    %79 = vector.load %arg2[%c2, %c0_61, %c0_62] : memref<4x32x8xf32, #tpu.memory_space<vmem>>, vector<1x32x8xf32>
    %80 = vector.shape_cast %79 : vector<1x32x8xf32> to vector<32x8xf32>
    %cst_63 = arith.constant dense<0.000000e+00> : vector<8x8xf32>
    %81 = tpu.matmul %1, %80, %cst_63 {dimension_numbers = #tpu.dot_dimension_numbers<[1], [0], [0], [1], [0, 0, 1, 1], [], []>} : vector<8x32xf32>, vector<32x8xf32>, vector<8x8xf32> -> vector<8x8xf32>
    %c2_64 = arith.constant 2 : index
    %c0_65 = arith.constant 0 : index
    %c0_66 = arith.constant 0 : index
    %82 = vector.load %arg3[%c2_64, %c0_65, %c0_66] : memref<4x1x8xf32, #tpu.memory_space<vmem>>, vector<1x1x8xf32>
    %83 = vector.shape_cast %82 : vector<1x1x8xf32> to vector<1x8xf32>
    %84 = vector.broadcast %83 : vector<1x8xf32> to vector<8x8xf32>
    %85 = arith.addf %81, %84 : vector<8x8xf32>
    %c2_67 = arith.constant 2 : index
    %c0_68 = arith.constant 0 : index
    %c0_69 = arith.constant 0 : index
    %86 = vector.load %arg4[%c2_67, %c0_68, %c0_69] : memref<4x32x8xf32, #tpu.memory_space<vmem>>, vector<1x32x8xf32>
    %87 = vector.shape_cast %86 : vector<1x32x8xf32> to vector<32x8xf32>
    %cst_70 = arith.constant dense<0.000000e+00> : vector<8x8xf32>
    %88 = tpu.matmul %1, %87, %cst_70 {dimension_numbers = #tpu.dot_dimension_numbers<[1], [0], [0], [1], [0, 0, 1, 1], [], []>} : vector<8x32xf32>, vector<32x8xf32>, vector<8x8xf32> -> vector<8x8xf32>
    %c2_71 = arith.constant 2 : index
    %c0_72 = arith.constant 0 : index
    %c0_73 = arith.constant 0 : index
    %89 = vector.load %arg5[%c2_71, %c0_72, %c0_73] : memref<4x1x8xf32, #tpu.memory_space<vmem>>, vector<1x1x8xf32>
    %90 = vector.shape_cast %89 : vector<1x1x8xf32> to vector<1x8xf32>
    %91 = vector.broadcast %90 : vector<1x8xf32> to vector<8x8xf32>
    %92 = arith.addf %88, %91 : vector<8x8xf32>
    %c2_74 = arith.constant 2 : index
    %c0_75 = arith.constant 0 : index
    %c0_76 = arith.constant 0 : index
    %93 = vector.load %arg6[%c2_74, %c0_75, %c0_76] : memref<4x32x8xf32, #tpu.memory_space<vmem>>, vector<1x32x8xf32>
    %94 = vector.shape_cast %93 : vector<1x32x8xf32> to vector<32x8xf32>
    %cst_77 = arith.constant dense<0.000000e+00> : vector<8x8xf32>
    %95 = tpu.matmul %1, %94, %cst_77 {dimension_numbers = #tpu.dot_dimension_numbers<[1], [0], [0], [1], [0, 0, 1, 1], [], []>} : vector<8x32xf32>, vector<32x8xf32>, vector<8x8xf32> -> vector<8x8xf32>
    %c2_78 = arith.constant 2 : index
    %c0_79 = arith.constant 0 : index
    %c0_80 = arith.constant 0 : index
    %96 = vector.load %arg7[%c2_78, %c0_79, %c0_80] : memref<4x1x8xf32, #tpu.memory_space<vmem>>, vector<1x1x8xf32>
    %97 = vector.shape_cast %96 : vector<1x1x8xf32> to vector<1x8xf32>
    %98 = vector.broadcast %97 : vector<1x8xf32> to vector<8x8xf32>
    %99 = arith.addf %95, %98 : vector<8x8xf32>
    %cst_81 = arith.constant dense<0.000000e+00> : vector<8x8xf32>
    %100 = tpu.matmul %85, %92, %cst_81 {dimension_numbers = #tpu.dot_dimension_numbers<[1], [1], [0], [0], [0, 0, 1, 0], [], []>} : vector<8x8xf32>, vector<8x8xf32>, vector<8x8xf32> -> vector<8x8xf32>
    %cst_82 = arith.constant 0.353553385 : f32
    %101 = vector.broadcast %cst_82 : f32 to vector<8x8xf32>
    %102 = arith.mulf %100, %101 : vector<8x8xf32>
    %cst_83 = arith.constant dense<0xFF800000> : vector<8xf32>
    %103 = vector.multi_reduction <maximumf>, %102, %cst_83 [1] : vector<8x8xf32> to vector<8xf32>
    %104 = vector.shape_cast %103 : vector<8xf32> to vector<8x1xf32>
    %105 = vector.broadcast %104 : vector<8x1xf32> to vector<8x8xf32>
    %106 = arith.subf %102, %105 : vector<8x8xf32>
    %107 = math.exp %106 : vector<8x8xf32>
    %cst_84 = arith.constant dense<0.000000e+00> : vector<8xf32>
    %108 = vector.multi_reduction <add>, %107, %cst_84 [1] : vector<8x8xf32> to vector<8xf32>
    %109 = vector.shape_cast %108 : vector<8xf32> to vector<8x1xf32>
    %110 = vector.broadcast %109 : vector<8x1xf32> to vector<8x8xf32>
    %111 = arith.divf %107, %110 : vector<8x8xf32>
    %cst_85 = arith.constant dense<0.000000e+00> : vector<8x8xf32>
    %112 = tpu.matmul %111, %99, %cst_85 {dimension_numbers = #tpu.dot_dimension_numbers<[1], [0], [0], [1], [0, 0, 1, 1], [], []>} : vector<8x8xf32>, vector<8x8xf32>, vector<8x8xf32> -> vector<8x8xf32>
    %c2_86 = arith.constant 2 : index
    %c0_87 = arith.constant 0 : index
    %c0_88 = arith.constant 0 : index
    %113 = vector.load %arg8[%c2_86, %c0_87, %c0_88] : memref<4x8x32xf32, #tpu.memory_space<vmem>>, vector<1x8x32xf32>
    %114 = vector.shape_cast %113 : vector<1x8x32xf32> to vector<8x32xf32>
    %cst_89 = arith.constant dense<0.000000e+00> : vector<8x32xf32>
    %115 = tpu.matmul %112, %114, %cst_89 {dimension_numbers = #tpu.dot_dimension_numbers<[1], [0], [0], [1], [0, 0, 1, 1], [], []>} : vector<8x8xf32>, vector<8x32xf32>, vector<8x32xf32> -> vector<8x32xf32>
    %116 = arith.addf %78, %115 : vector<8x32xf32>
    %c3 = arith.constant 3 : index
    %c0_90 = arith.constant 0 : index
    %c0_91 = arith.constant 0 : index
    %117 = vector.load %arg2[%c3, %c0_90, %c0_91] : memref<4x32x8xf32, #tpu.memory_space<vmem>>, vector<1x32x8xf32>
    %118 = vector.shape_cast %117 : vector<1x32x8xf32> to vector<32x8xf32>
    %cst_92 = arith.constant dense<0.000000e+00> : vector<8x8xf32>
    %119 = tpu.matmul %1, %118, %cst_92 {dimension_numbers = #tpu.dot_dimension_numbers<[1], [0], [0], [1], [0, 0, 1, 1], [], []>} : vector<8x32xf32>, vector<32x8xf32>, vector<8x8xf32> -> vector<8x8xf32>
    %c3_93 = arith.constant 3 : index
    %c0_94 = arith.constant 0 : index
    %c0_95 = arith.constant 0 : index
    %120 = vector.load %arg3[%c3_93, %c0_94, %c0_95] : memref<4x1x8xf32, #tpu.memory_space<vmem>>, vector<1x1x8xf32>
    %121 = vector.shape_cast %120 : vector<1x1x8xf32> to vector<1x8xf32>
    %122 = vector.broadcast %121 : vector<1x8xf32> to vector<8x8xf32>
    %123 = arith.addf %119, %122 : vector<8x8xf32>
    %c3_96 = arith.constant 3 : index
    %c0_97 = arith.constant 0 : index
    %c0_98 = arith.constant 0 : index
    %124 = vector.load %arg4[%c3_96, %c0_97, %c0_98] : memref<4x32x8xf32, #tpu.memory_space<vmem>>, vector<1x32x8xf32>
    %125 = vector.shape_cast %124 : vector<1x32x8xf32> to vector<32x8xf32>
    %cst_99 = arith.constant dense<0.000000e+00> : vector<8x8xf32>
    %126 = tpu.matmul %1, %125, %cst_99 {dimension_numbers = #tpu.dot_dimension_numbers<[1], [0], [0], [1], [0, 0, 1, 1], [], []>} : vector<8x32xf32>, vector<32x8xf32>, vector<8x8xf32> -> vector<8x8xf32>
    %c3_100 = arith.constant 3 : index
    %c0_101 = arith.constant 0 : index
    %c0_102 = arith.constant 0 : index
    %127 = vector.load %arg5[%c3_100, %c0_101, %c0_102] : memref<4x1x8xf32, #tpu.memory_space<vmem>>, vector<1x1x8xf32>
    %128 = vector.shape_cast %127 : vector<1x1x8xf32> to vector<1x8xf32>
    %129 = vector.broadcast %128 : vector<1x8xf32> to vector<8x8xf32>
    %130 = arith.addf %126, %129 : vector<8x8xf32>
    %c3_103 = arith.constant 3 : index
    %c0_104 = arith.constant 0 : index
    %c0_105 = arith.constant 0 : index
    %131 = vector.load %arg6[%c3_103, %c0_104, %c0_105] : memref<4x32x8xf32, #tpu.memory_space<vmem>>, vector<1x32x8xf32>
    %132 = vector.shape_cast %131 : vector<1x32x8xf32> to vector<32x8xf32>
    %cst_106 = arith.constant dense<0.000000e+00> : vector<8x8xf32>
    %133 = tpu.matmul %1, %132, %cst_106 {dimension_numbers = #tpu.dot_dimension_numbers<[1], [0], [0], [1], [0, 0, 1, 1], [], []>} : vector<8x32xf32>, vector<32x8xf32>, vector<8x8xf32> -> vector<8x8xf32>
    %c3_107 = arith.constant 3 : index
    %c0_108 = arith.constant 0 : index
    %c0_109 = arith.constant 0 : index
    %134 = vector.load %arg7[%c3_107, %c0_108, %c0_109] : memref<4x1x8xf32, #tpu.memory_space<vmem>>, vector<1x1x8xf32>
    %135 = vector.shape_cast %134 : vector<1x1x8xf32> to vector<1x8xf32>
    %136 = vector.broadcast %135 : vector<1x8xf32> to vector<8x8xf32>
    %137 = arith.addf %133, %136 : vector<8x8xf32>
    %cst_110 = arith.constant dense<0.000000e+00> : vector<8x8xf32>
    %138 = tpu.matmul %123, %130, %cst_110 {dimension_numbers = #tpu.dot_dimension_numbers<[1], [1], [0], [0], [0, 0, 1, 0], [], []>} : vector<8x8xf32>, vector<8x8xf32>, vector<8x8xf32> -> vector<8x8xf32>
    %cst_111 = arith.constant 0.353553385 : f32
    %139 = vector.broadcast %cst_111 : f32 to vector<8x8xf32>
    %140 = arith.mulf %138, %139 : vector<8x8xf32>
    %cst_112 = arith.constant dense<0xFF800000> : vector<8xf32>
    %141 = vector.multi_reduction <maximumf>, %140, %cst_112 [1] : vector<8x8xf32> to vector<8xf32>
    %142 = vector.shape_cast %141 : vector<8xf32> to vector<8x1xf32>
    %143 = vector.broadcast %142 : vector<8x1xf32> to vector<8x8xf32>
    %144 = arith.subf %140, %143 : vector<8x8xf32>
    %145 = math.exp %144 : vector<8x8xf32>
    %cst_113 = arith.constant dense<0.000000e+00> : vector<8xf32>
    %146 = vector.multi_reduction <add>, %145, %cst_113 [1] : vector<8x8xf32> to vector<8xf32>
    %147 = vector.shape_cast %146 : vector<8xf32> to vector<8x1xf32>
    %148 = vector.broadcast %147 : vector<8x1xf32> to vector<8x8xf32>
    %149 = arith.divf %145, %148 : vector<8x8xf32>
    %cst_114 = arith.constant dense<0.000000e+00> : vector<8x8xf32>
    %150 = tpu.matmul %149, %137, %cst_114 {dimension_numbers = #tpu.dot_dimension_numbers<[1], [0], [0], [1], [0, 0, 1, 1], [], []>} : vector<8x8xf32>, vector<8x8xf32>, vector<8x8xf32> -> vector<8x8xf32>
    %c3_115 = arith.constant 3 : index
    %c0_116 = arith.constant 0 : index
    %c0_117 = arith.constant 0 : index
    %151 = vector.load %arg8[%c3_115, %c0_116, %c0_117] : memref<4x8x32xf32, #tpu.memory_space<vmem>>, vector<1x8x32xf32>
    %152 = vector.shape_cast %151 : vector<1x8x32xf32> to vector<8x32xf32>
    %cst_118 = arith.constant dense<0.000000e+00> : vector<8x32xf32>
    %153 = tpu.matmul %150, %152, %cst_118 {dimension_numbers = #tpu.dot_dimension_numbers<[1], [0], [0], [1], [0, 0, 1, 1], [], []>} : vector<8x8xf32>, vector<8x32xf32>, vector<8x32xf32> -> vector<8x32xf32>
    %154 = arith.addf %116, %153 : vector<8x32xf32>
    %c0_119 = arith.constant 0 : index
    %c0_120 = arith.constant 0 : index
    %155 = vector.load %arg9[%c0_119, %c0_120] : memref<1x32xf32, #tpu.memory_space<vmem>>, vector<1x32xf32>
    %156 = vector.broadcast %155 : vector<1x32xf32> to vector<8x32xf32>
    %157 = arith.addf %154, %156 : vector<8x32xf32>
    %158 = arith.addf %1, %157 : vector<8x32xf32>
    %c0_121 = arith.constant 0 : index
    %c0_122 = arith.constant 0 : index
    %159 = vector.load %arg14[%c0_121, %c0_122] : memref<1x32xf32, #tpu.memory_space<vmem>>, vector<1x32xf32>
    %c0_123 = arith.constant 0 : index
    %c0_124 = arith.constant 0 : index
    %160 = vector.load %arg15[%c0_123, %c0_124] : memref<1x32xf32, #tpu.memory_space<vmem>>, vector<1x32xf32>
    %cst_125 = arith.constant dense<0.000000e+00> : vector<8xf32>
    %161 = vector.multi_reduction <add>, %158, %cst_125 [1] : vector<8x32xf32> to vector<8xf32>
    %162 = vector.shape_cast %161 : vector<8xf32> to vector<8x1xf32>
    %cst_126 = arith.constant 3.200000e+01 : f32
    %163 = vector.broadcast %cst_126 : f32 to vector<8x1xf32>
    %164 = arith.divf %162, %163 : vector<8x1xf32>
    %165 = vector.broadcast %164 : vector<8x1xf32> to vector<8x32xf32>
    %166 = arith.subf %158, %165 : vector<8x32xf32>
    %167 = arith.mulf %166, %166 : vector<8x32xf32>
    %cst_127 = arith.constant dense<0.000000e+00> : vector<8xf32>
    %168 = vector.multi_reduction <add>, %167, %cst_127 [1] : vector<8x32xf32> to vector<8xf32>
    %169 = vector.shape_cast %168 : vector<8xf32> to vector<8x1xf32>
    %cst_128 = arith.constant 3.200000e+01 : f32
    %170 = vector.broadcast %cst_128 : f32 to vector<8x1xf32>
    %171 = arith.divf %169, %170 : vector<8x1xf32>
    %cst_129 = arith.constant 9.99999974E-6 : f32
    %172 = vector.broadcast %cst_129 : f32 to vector<8x1xf32>
    %173 = arith.addf %171, %172 : vector<8x1xf32>
    %174 = math.rsqrt %173 : vector<8x1xf32>
    %175 = vector.broadcast %174 : vector<8x1xf32> to vector<8x32xf32>
    %176 = arith.mulf %166, %175 : vector<8x32xf32>
    %177 = vector.broadcast %159 : vector<1x32xf32> to vector<8x32xf32>
    %178 = arith.mulf %176, %177 : vector<8x32xf32>
    %179 = vector.broadcast %160 : vector<1x32xf32> to vector<8x32xf32>
    %180 = arith.addf %178, %179 : vector<8x32xf32>
    %c0_130 = arith.constant 0 : index
    %c0_131 = arith.constant 0 : index
    %181 = vector.load %arg10[%c0_130, %c0_131] : memref<32x64xf32, #tpu.memory_space<vmem>>, vector<32x64xf32>
    %cst_132 = arith.constant dense<0.000000e+00> : vector<8x64xf32>
    %182 = tpu.matmul %180, %181, %cst_132 {dimension_numbers = #tpu.dot_dimension_numbers<[1], [0], [0], [1], [0, 0, 1, 1], [], []>} : vector<8x32xf32>, vector<32x64xf32>, vector<8x64xf32> -> vector<8x64xf32>
    %c0_133 = arith.constant 0 : index
    %c0_134 = arith.constant 0 : index
    %183 = vector.load %arg11[%c0_133, %c0_134] : memref<1x64xf32, #tpu.memory_space<vmem>>, vector<1x64xf32>
    %184 = vector.broadcast %183 : vector<1x64xf32> to vector<8x64xf32>
    %185 = arith.addf %182, %184 : vector<8x64xf32>
    %cst_135 = arith.constant 5.000000e-01 : f32
    %186 = vector.broadcast %cst_135 : f32 to vector<8x64xf32>
    %187 = arith.mulf %186, %185 : vector<8x64xf32>
    %cst_136 = arith.constant 0.707106769 : f32
    %188 = vector.broadcast %cst_136 : f32 to vector<8x64xf32>
    %189 = arith.mulf %185, %188 : vector<8x64xf32>
    %cst_137 = arith.constant 0.000000e+00 : f32
    %190 = vector.broadcast %cst_137 : f32 to vector<8x64xf32>
    %191 = arith.cmpf oge, %189, %190 : vector<8x64xf32>
    %cst_138 = arith.constant 1.000000e+00 : f32
    %cst_139 = arith.constant -1.000000e+00 : f32
    %192 = vector.broadcast %cst_138 : f32 to vector<8x64xf32>
    %193 = vector.broadcast %cst_139 : f32 to vector<8x64xf32>
    %194 = arith.select %191, %192, %193 : vector<8x64xi1>, vector<8x64xf32>
    %195 = math.absf %189 : vector<8x64xf32>
    %cst_140 = arith.constant 0.327591091 : f32
    %196 = vector.broadcast %cst_140 : f32 to vector<8x64xf32>
    %197 = arith.mulf %196, %195 : vector<8x64xf32>
    %cst_141 = arith.constant 1.000000e+00 : f32
    %198 = vector.broadcast %cst_141 : f32 to vector<8x64xf32>
    %199 = arith.addf %198, %197 : vector<8x64xf32>
    %cst_142 = arith.constant 1.000000e+00 : f32
    %200 = vector.broadcast %cst_142 : f32 to vector<8x64xf32>
    %201 = arith.divf %200, %199 : vector<8x64xf32>
    %cst_143 = arith.constant 1.06140542 : f32
    %202 = vector.broadcast %cst_143 : f32 to vector<8x64xf32>
    %203 = arith.mulf %202, %201 : vector<8x64xf32>
    %cst_144 = arith.constant -1.45315206 : f32
    %204 = vector.broadcast %cst_144 : f32 to vector<8x64xf32>
    %205 = arith.addf %203, %204 : vector<8x64xf32>
    %206 = arith.mulf %205, %201 : vector<8x64xf32>
    %cst_145 = arith.constant 1.42141378 : f32
    %207 = vector.broadcast %cst_145 : f32 to vector<8x64xf32>
    %208 = arith.addf %206, %207 : vector<8x64xf32>
    %209 = arith.mulf %208, %201 : vector<8x64xf32>
    %cst_146 = arith.constant -0.284496725 : f32
    %210 = vector.broadcast %cst_146 : f32 to vector<8x64xf32>
    %211 = arith.addf %209, %210 : vector<8x64xf32>
    %212 = arith.mulf %211, %201 : vector<8x64xf32>
    %cst_147 = arith.constant 0.254829586 : f32
    %213 = vector.broadcast %cst_147 : f32 to vector<8x64xf32>
    %214 = arith.addf %212, %213 : vector<8x64xf32>
    %215 = arith.mulf %214, %201 : vector<8x64xf32>
    %cst_148 = arith.constant 0.000000e+00 : f32
    %216 = vector.broadcast %cst_148 : f32 to vector<8x64xf32>
    %217 = arith.subf %216, %195 : vector<8x64xf32>
    %218 = arith.mulf %217, %195 : vector<8x64xf32>
    %219 = math.exp %218 : vector<8x64xf32>
    %220 = arith.mulf %215, %219 : vector<8x64xf32>
    %cst_149 = arith.constant 1.000000e+00 : f32
    %221 = vector.broadcast %cst_149 : f32 to vector<8x64xf32>
    %222 = arith.subf %221, %220 : vector<8x64xf32>
    %223 = arith.mulf %194, %222 : vector<8x64xf32>
    %cst_150 = arith.constant 1.000000e+00 : f32
    %224 = vector.broadcast %cst_150 : f32 to vector<8x64xf32>
    %225 = arith.addf %224, %223 : vector<8x64xf32>
    %226 = arith.mulf %187, %225 : vector<8x64xf32>
    %c0_151 = arith.constant 0 : index
    %c0_152 = arith.constant 0 : index
    %227 = vector.load %arg12[%c0_151, %c0_152] : memref<64x32xf32, #tpu.memory_space<vmem>>, vector<64x32xf32>
    %cst_153 = arith.constant dense<0.000000e+00> : vector<8x32xf32>
    %228 = tpu.matmul %226, %227, %cst_153 {dimension_numbers = #tpu.dot_dimension_numbers<[1], [0], [0], [1], [0, 0, 1, 1], [], []>} : vector<8x64xf32>, vector<64x32xf32>, vector<8x32xf32> -> vector<8x32xf32>
    %c0_154 = arith.constant 0 : index
    %c0_155 = arith.constant 0 : index
    %229 = vector.load %arg13[%c0_154, %c0_155] : memref<1x32xf32, #tpu.memory_space<vmem>>, vector<1x32xf32>
    %230 = vector.broadcast %229 : vector<1x32xf32> to vector<8x32xf32>
    %231 = arith.addf %228, %230 : vector<8x32xf32>
    %232 = arith.addf %180, %231 : vector<8x32xf32>
    %c0_156 = arith.constant 0 : index
    %c0_157 = arith.constant 0 : index
    %233 = vector.load %arg16[%c0_156, %c0_157] : memref<1x32xf32, #tpu.memory_space<vmem>>, vector<1x32xf32>
    %c0_158 = arith.constant 0 : index
    %c0_159 = arith.constant 0 : index
    %234 = vector.load %arg17[%c0_158, %c0_159] : memref<1x32xf32, #tpu.memory_space<vmem>>, vector<1x32xf32>
    %cst_160 = arith.constant dense<0.000000e+00> : vector<8xf32>
    %235 = vector.multi_reduction <add>, %232, %cst_160 [1] : vector<8x32xf32> to vector<8xf32>
    %236 = vector.shape_cast %235 : vector<8xf32> to vector<8x1xf32>
    %cst_161 = arith.constant 3.200000e+01 : f32
    %237 = vector.broadcast %cst_161 : f32 to vector<8x1xf32>
    %238 = arith.divf %236, %237 : vector<8x1xf32>
    %239 = vector.broadcast %238 : vector<8x1xf32> to vector<8x32xf32>
    %240 = arith.subf %232, %239 : vector<8x32xf32>
    %241 = arith.mulf %240, %240 : vector<8x32xf32>
    %cst_162 = arith.constant dense<0.000000e+00> : vector<8xf32>
    %242 = vector.multi_reduction <add>, %241, %cst_162 [1] : vector<8x32xf32> to vector<8xf32>
    %243 = vector.shape_cast %242 : vector<8xf32> to vector<8x1xf32>
    %cst_163 = arith.constant 3.200000e+01 : f32
    %244 = vector.broadcast %cst_163 : f32 to vector<8x1xf32>
    %245 = arith.divf %243, %244 : vector<8x1xf32>
    %cst_164 = arith.constant 9.99999974E-6 : f32
    %246 = vector.broadcast %cst_164 : f32 to vector<8x1xf32>
    %247 = arith.addf %245, %246 : vector<8x1xf32>
    %248 = math.rsqrt %247 : vector<8x1xf32>
    %249 = vector.broadcast %248 : vector<8x1xf32> to vector<8x32xf32>
    %250 = arith.mulf %240, %249 : vector<8x32xf32>
    %251 = vector.broadcast %233 : vector<1x32xf32> to vector<8x32xf32>
    %252 = arith.mulf %250, %251 : vector<8x32xf32>
    %253 = vector.broadcast %234 : vector<1x32xf32> to vector<8x32xf32>
    %254 = arith.addf %252, %253 : vector<8x32xf32>
    %c0_165 = arith.constant 0 : index
    %c0_166 = arith.constant 0 : index
    %c0_167 = arith.constant 0 : index
    %255 = vector.load %arg18[%c0_165, %c0_166, %c0_167] : memref<1x8x32xf32, #tpu.memory_space<vmem>>, vector<1x8x32xf32>
    %256 = vector.shape_cast %255 : vector<1x8x32xf32> to vector<8x32xf32>
    %257 = vector.shape_cast %254 : vector<8x32xf32> to vector<1x8x32xf32>
    tpu.vector_store %arg18[%c0_165, %c0_166, %c0_167], %257 {strides = array<i32>} : memref<1x8x32xf32, #tpu.memory_space<vmem>>, vector<1x8x32xf32>,
    return
  }
  func.func @transform_0(%arg0: i32) -> (i32, i32, i32) {
    %c0_i32 = arith.constant 0 : i32
    %c0_i32_0 = arith.constant 0 : i32
    %c0_i32_1 = arith.constant 0 : i32
    return %arg0, %c0_i32, %c0_i32_0 : i32, i32, i32
  }
  func.func @transform_1(%arg0: i32) -> (i32, i32, i32) {
    %c0_i32 = arith.constant 0 : i32
    %c0_i32_0 = arith.constant 0 : i32
    %c0_i32_1 = arith.constant 0 : i32
    %c0_i32_2 = arith.constant 0 : i32
    return %c0_i32, %c0_i32_0, %c0_i32_1 : i32, i32, i32
  }
  func.func @transform_2(%arg0: i32) -> (i32, i32, i32) {
    %c0_i32 = arith.constant 0 : i32
    %c0_i32_0 = arith.constant 0 : i32
    %c0_i32_1 = arith.constant 0 : i32
    %c0_i32_2 = arith.constant 0 : i32
    return %c0_i32, %c0_i32_0, %c0_i32_1 : i32, i32, i32
  }
  func.func @transform_3(%arg0: i32) -> (i32, i32, i32) {
    %c0_i32 = arith.constant 0 : i32
    %c0_i32_0 = arith.constant 0 : i32
    %c0_i32_1 = arith.constant 0 : i32
    %c0_i32_2 = arith.constant 0 : i32
    return %c0_i32, %c0_i32_0, %c0_i32_1 : i32, i32, i32
  }
  func.func @transform_4(%arg0: i32) -> (i32, i32, i32) {
    %c0_i32 = arith.constant 0 : i32
    %c0_i32_0 = arith.constant 0 : i32
    %c0_i32_1 = arith.constant 0 : i32
    %c0_i32_2 = arith.constant 0 : i32
    return %c0_i32, %c0_i32_0, %c0_i32_1 : i32, i32, i32
  }
  func.func @transform_5(%arg0: i32) -> (i32, i32, i32) {
    %c0_i32 = arith.constant 0 : i32
    %c0_i32_0 = arith.constant 0 : i32
    %c0_i32_1 = arith.constant 0 : i32
    %c0_i32_2 = arith.constant 0 : i32
    return %c0_i32, %c0_i32_0, %c0_i32_1 : i32, i32, i32
  }
  func.func @transform_6(%arg0: i32) -> (i32, i32, i32) {
    %c0_i32 = arith.constant 0 : i32
    %c0_i32_0 = arith.constant 0 : i32
    %c0_i32_1 = arith.constant 0 : i32
    %c0_i32_2 = arith.constant 0 : i32
    return %c0_i32, %c0_i32_0, %c0_i32_1 : i32, i32, i32
  }
  func.func @transform_7(%arg0: i32) -> (i32, i32, i32) {
    %c0_i32 = arith.constant 0 : i32
    %c0_i32_0 = arith.constant 0 : i32
    %c0_i32_1 = arith.constant 0 : i32
    %c0_i32_2 = arith.constant 0 : i32
    return %c0_i32, %c0_i32_0, %c0_i32_1 : i32, i32, i32
  }
  func.func @transform_8(%arg0: i32) -> (i32, i32) {
    %c0_i32 = arith.constant 0 : i32
    %c0_i32_0 = arith.constant 0 : i32
    %c0_i32_1 = arith.constant 0 : i32
    return %c0_i32, %c0_i32_0 : i32, i32
  }
  func.func @transform_9(%arg0: i32) -> (i32, i32) {
    %c0_i32 = arith.constant 0 : i32
    %c0_i32_0 = arith.constant 0 : i32
    %c0_i32_1 = arith.constant 0 : i32
    return %c0_i32, %c0_i32_0 : i32, i32
  }
  func.func @transform_10(%arg0: i32) -> (i32, i32) {
    %c0_i32 = arith.constant 0 : i32
    %c0_i32_0 = arith.constant 0 : i32
    %c0_i32_1 = arith.constant 0 : i32
    return %c0_i32, %c0_i32_0 : i32, i32
  }
  func.func @transform_11(%arg0: i32) -> (i32, i32) {
    %c0_i32 = arith.constant 0 : i32
    %c0_i32_0 = arith.constant 0 : i32
    %c0_i32_1 = arith.constant 0 : i32
    return %c0_i32, %c0_i32_0 : i32, i32
  }
  func.func @transform_12(%arg0: i32) -> (i32, i32) {
    %c0_i32 = arith.constant 0 : i32
    %c0_i32_0 = arith.constant 0 : i32
    %c0_i32_1 = arith.constant 0 : i32
    return %c0_i32, %c0_i32_0 : i32, i32
  }
  func.func @transform_13(%arg0: i32) -> (i32, i32) {
    %c0_i32 = arith.constant 0 : i32
    %c0_i32_0 = arith.constant 0 : i32
    %c0_i32_1 = arith.constant 0 : i32
    return %c0_i32, %c0_i32_0 : i32, i32
  }
  func.func @transform_14(%arg0: i32) -> (i32, i32) {
    %c0_i32 = arith.constant 0 : i32
    %c0_i32_0 = arith.constant 0 : i32
    %c0_i32_1 = arith.constant 0 : i32
    return %c0_i32, %c0_i32_0 : i32, i32
  }
  func.func @transform_15(%arg0: i32) -> (i32, i32) {
    %c0_i32 = arith.constant 0 : i32
    %c0_i32_0 = arith.constant 0 : i32
    %c0_i32_1 = arith.constant 0 : i32
    return %c0_i32, %c0_i32_0 : i32, i32
  }
  func.func @transform_16(%arg0: i32) -> (i32, i32) {
    %c0_i32 = arith.constant 0 : i32
    %c0_i32_0 = arith.constant 0 : i32
    %c0_i32_1 = arith.constant 0 : i32
    return %c0_i32, %c0_i32_0 : i32, i32
  }
  func.func @transform_17(%arg0: i32) -> (i32, i32, i32) {
    %c0_i32 = arith.constant 0 : i32
    %c0_i32_0 = arith.constant 0 : i32
    %c0_i32_1 = arith.constant 0 : i32
    return %arg0, %c0_i32, %c0_i32_0 : i32, i32, i32
  }
}

</mosaic_0001>

<bundles_post_ra>
// kernel: tpu_custom_call.1
= control target key start
LH: loop header
LB: loop body
LE: loop exit
PB: predicated region body
PF: predicated region fallthrough
CT: control target
= control target key end

     0   :  { %s4074_s0 = inlined_call_operand.vmem [shape: f32[2,8,32], index: 0, kind: input, shape index: {}]   ;;  %s4075_s1 = inlined_call_operand.vmem [shape: f32[4,32,8], index: 1, kind: input, shape index: {}]   ;;  %s4076_s2 = inlined_call_operand.vmem [shape: f32[4,1,8], index: 2, kind: input, shape index: {}]   ;;  %s4077_s3 = inlined_call_operand.vmem [shape: f32[4,32,8], index: 3, kind: input, shape index: {}]   ;;  %s4078_s4 = inlined_call_operand.vmem [shape: f32[4,1,8], index: 4, kind: input, shape index: {}]   ;;  %s4079_s5 = inlined_call_operand.vmem [shape: f32[4,32,8], index: 5, kind: input, shape index: {}]   ;;  %s4080_s6 = inlined_call_operand.vmem [shape: f32[4,1,8], index: 6, kind: input, shape index: {}]   ;;  %s4081_s7 = inlined_call_operand.vmem [shape: f32[4,8,32], index: 7, kind: input, shape index: {}]   ;;  %s4082_s8 = inlined_call_operand.vmem [shape: f32[1,32], index: 8, kind: input, shape index: {}]   ;;  %s4083_s9 = inlined_call_operand.vmem [shape: f32[32,64], index: 9, kind: input, shape index: {}]   ;;  %s4084_s10 = inlined_call_operand.vmem [shape: f32[1,64], index: 10, kind: input, shape index: {}]   ;;  %s4085_s11 = inlined_call_operand.vmem [shape: f32[64,32], index: 11, kind: input, shape index: {}]   ;;  %s4086_s12 = inlined_call_operand.vmem [shape: f32[1,32], index: 12, kind: input, shape index: {}]   ;;  %s4087_s13 = inlined_call_operand.vmem [shape: f32[1,32], index: 13, kind: input, shape index: {}]   ;;  %s4088_s14 = inlined_call_operand.vmem [shape: f32[1,32], index: 14, kind: input, shape index: {}]   ;;  %s4089_s15 = inlined_call_operand.vmem [shape: f32[1,32], index: 15, kind: input, shape index: {}]   ;;  %s4090_s16 = inlined_call_operand.vmem [shape: f32[1,32], index: 16, kind: input, shape index: {}]   ;;  %s4091_s17 = inlined_call_operand.hbm [shape: f32[2,8,32], index: 17, kind: output, shape index: {}]  }
   0x1   :  { %4098 = sst [smem:[#allocation10_spill]] %s4074_s0 }
   0x2   :  { %4099 = sst [smem:[#allocation11_spill]] %s4075_s1 }
   0x3   :  { %4100 = sst [smem:[#allocation12_spill]] %s4076_s2 }
   0x4   :  { %4101 = sst [smem:[#allocation13_spill]] %s4077_s3 }
   0x5   :  { %22 = vsyncpa [#allocation3], 0 }
   0x6   :  { %24 = vsyncpa [#allocation3 + $0x1], 0  ;;  %s3571_s24 = smov 0   ;;  %s3573_s25 = smov 0  }
   0x7   :  { %s3575_s26 = smov 0   ;;  %s3577_s27 = smov 0  }
   0x8 LB: > { %4102 = sst [smem:[#allocation5_spill]] %s3462_s24  ;;  %s3592_s28 = sadd.s32 4294967295, %s3474_s27   ;;  %s3474_s27 = sphi %s3577_s27, %s4115_s27   ;;  %s3470_s26 = sphi %s3575_s26, %s4117_s26   ;;  %s3466_s25 = sphi %s3573_s25, %s4119_s25   ;;  %s3462_s24 = sphi %s3571_s24, %s4118_s24  }
   0x9   : > { %4103 = sst [smem:[#allocation6_spill]] %s3470_s26  ;;  %s2828_s29 = sadd.s32 4294967294, %s3474_s27  }
   0xa   : > { %s3596_s0 = sadd.s32 1, %s3474_s27   ;;  %s399_s30 = sadd.s32 1, %s3470_s26 }
   0xb   : > { %4104 = sst [smem:[#allocation7_spill]] %s3596_s0  ;;  %s396_s18 = ssub.s32 %s3474_s27, %s3596_s0 }
   0xc   : > { %p409_p0 = scmp.ne.s32.totalorder %s3470_s26, %s3466_s25  ;;  %p397_p1 = scmp.eq.s32.totalorder %s396_s18, 0 }
   0xd   : > { %p410_p2 = scmp.eq.s32.totalorder %s3592_s28, 1  ;;  %p415_p3 = scmp.ne.s32.totalorder %s3466_s25, %s3462_s24 }
   0xe   : > { %p416_p4 = scmp.eq.s32.totalorder %s2828_s29, 1  ;;  %p2831_p7 = scmp.ge.s32.totalorder %s3474_s27, 1 }
   0xf   : > { %s3607_s19 = scalar_select %p397_p1, %s3470_s26, %s399_s30  }
  0x10   : > { %p3609_p5 = por %p410_p2, %p409_p0  ;;  %p3613_p6 = por %p416_p4, %p415_p3 }
  0x11   : > { %4105 = sst [smem:[#allocation8_spill]] %s3607_s19  ;;  %p489_p8 = scmp.lt.s32.totalorder %s3474_s27, 3 }
  0x12   : > { %s4107_s20 = scalar_select %p3613_p6, 1, 0 }
  0x13   : > { %p490_p9 = pnand %p2831_p7, %p489_p8 }
  0x14   : > { %4108 = sst [smem:[#allocation9_spill]] %s4107_s20  ;;  %s4109_s3 = sld [smem:[#allocation13_spill]] (!%p490_p9)  ;;  %v3476_v3 = vmov (!%p490_p9), 0.0|0.0   ;;  %vm3477_vm0 = vmmov (!%p490_p9), 0   ;;  %v3478_v11 = vmov (!%p490_p9), 0.0   ;;  %v711_v14 = vld [vmem:[%s4079_s5] sm:$0xff] (!%p490_p9) }
  0x15   : > { %493 = sbr.rel (%p490_p9) target bundleno = 5008 (0x1390), region = 88  ;;  %s4110_s19 = sld [smem:[#allocation11_spill]] (!%p490_p9)  ;;  %3261 = vmatprep.subr.bf16.mxu1 (!%p490_p9), %v3476_v3  ;;  %3255 = vmatprep.subr.bf16.mxu0 (!%p490_p9), %v3476_v3  ;;  %v712_v15 = vld [vmem:[%s4079_s5 + $0x8] sm:$0xff] (!%p490_p9)  ;;  %vm556_vm1 = vcmask (!%p490_p9), 261120   ;;  %v713_v18 = vld [vmem:[%s4079_s5 + $0x10] sm:$0xff] (!%p490_p9)  ;;  %v714_v19 = vld [vmem:[%s4079_s5 + $0x18] sm:$0xff] (!%p490_p9) }
  0x16   : > { %p540_p10 = scmp.lt.s32.totalorder (!%p490_p9), %s3592_s28, 1  ;;  %3052 = vmatprep.mubr.msk.f32.mxu1 (!%p490_p9), %vm3477_vm0, %v3478_v11  ;;  %3041 = vmatprep.mubr.msk.f32.mxu0 (!%p490_p9), %vm3477_vm0, %v3478_v11  ;;  %s4111_s30 = sld [smem:[#allocation10_spill]] (!%p490_p9)  ;;  %v3268_v17 = vpack.c.bf16 (!%p490_p9), %v712_v15, %v711_v14  ;;  %v3271_v20 = vpack.c.bf16 (!%p490_p9), %v714_v19, %v713_v18  ;;  %v2836_v21 = vld [vmem:[%s4078_s4] ss:$0 sm:$0xff] (!%p490_p9)  ;;  %vm792_vm2 = vcmask (!%p490_p9), 64512   ;;  %vm2650_vm4 = vcmask (!%p490_p9), 523264  }
  0x17   : > { %s4112_s2 = sld [smem:[#allocation12_spill]] (!%p490_p9)  ;;  %v2838_v29 = vld [vmem:[%s4080_s6] ss:$0 sm:$0xff] (!%p490_p9)  ;;  %v2855_v61 = vld [vmem:[%s4078_s4 + $0x1] ss:$0 sm:$0xff] (!%p490_p9)  ;;  %s537_s20 = sand.u32 (!%p490_p9), 1, %s3466_s25  }
  0x18   : > { %s2832_s21 = sshll.u32 (!%p490_p9), %s537_s20, 3 }
  0x1a   : > { %v630_v0 = vld [vmem:[%s4109_s3] sm:$0xff] (!%p490_p9)  ;;  %v631_v1 = vld [vmem:[%s4109_s3 + $0x8] sm:$0xff] (!%p490_p9)  ;;  %v632_v6 = vld [vmem:[%s4109_s3 + $0x10] sm:$0xff] (!%p490_p9) }
  0x1b   : > { %v545_v2 = vld [vmem:[%s4110_s19] sm:$0xff] (!%p490_p9)  ;;  %v3262_v4 = vpack.c.bf16 (!%p490_p9), %v631_v1, %v630_v0  ;;  %v546_v5 = vld [vmem:[%s4110_s19 + $0x8] sm:$0xff] (!%p490_p9)  ;;  %v633_v7 = vld [vmem:[%s4109_s3 + $0x18] sm:$0xff] (!%p490_p9) }
  0x1c   : > { %v3256_v8 = vpack.c.bf16 %v546_v5, %v545_v2  ;;  %v547_v9 = vld [vmem:[%s4110_s19 + $0x10] sm:$0xff]  ;;  %v548_v10 = vld [vmem:[%s4110_s19 + $0x18] sm:$0xff]  ;;  %v3265_v12 = vpack.c.bf16 %v633_v7, %v632_v6  ;;  %s541_s26 = scalar_select %p540_p10, %s3592_s28, 1  ;;  %v2843_v42 = vld [vmem:[%s4110_s19 + $0x20] sm:$0xff] }
  0x1d   : > { %3263 = vmatpush3.bf16.msra.mxu1 %v3262_v4  ;;  %v3259_v13 = vpack.c.bf16 %v548_v10, %v547_v9  ;;  %v2834_v22 = vld [vmem:[%s4112_s2] ss:$0 sm:$0xff]  ;;  %v2844_v43 = vld [vmem:[%s4110_s19 + $0x28] sm:$0xff]  ;;  %v2845_v45 = vld [vmem:[%s4110_s19 + $0x30] sm:$0xff] }
  0x1e   : > { %3257 = vmatpush3.bf16.msra.mxu0 %v3256_v8  ;;  %3264 = vmatprep.subr.bf16.mxu1 %v3476_v3  ;;  %s2833_s0 = sshll.u32 %s541_s26, 3  ;;  %v3274_v44 = vpack.c.bf16 %v2844_v43, %v2843_v42  ;;  %v2846_v46 = vld [vmem:[%s4110_s19 + $0x38] sm:$0xff]  ;;  %v2850_v49 = vld [vmem:[%s4109_s3 + $0x20] sm:$0xff]  ;;  %v2851_v50 = vld [vmem:[%s4109_s3 + $0x28] sm:$0xff] }
  0x1f   : > { %3258 = vmatprep.subr.bf16.mxu0 %v3476_v3  ;;  %s543_s18 = scalar_lea.vmem %s4111_s30, %s2833_s0  ;;  %v3277_v47 = vpack.c.bf16 %v2846_v46, %v2845_v45  ;;  %v3280_v52 = vpack.c.bf16 %v2851_v50, %v2850_v49  ;;  %v2852_v54 = vld [vmem:[%s4109_s3 + $0x30] sm:$0xff]  ;;  %v2853_v55 = vld [vmem:[%s4109_s3 + $0x38] sm:$0xff]  ;;  %v2848_v62 = vld [vmem:[%s4112_s2 + $0x1] ss:$0 sm:$0xff]  ;;  %s2932_s30 = sshll.u32 %s3592_s28, 7 }
  0x20   : > { %v3662_v16 = vld [vmem:[%s543_s18] sm:$0xff]  ;;  %v3283_v56 = vpack.c.bf16 %v2853_v55, %v2852_v54  ;;  %v2858_v5 = vld [vmem:[%s4079_s5 + $0x28] sm:$0xff]  ;;  %v2859_v6 = vld [vmem:[%s4079_s5 + $0x30] sm:$0xff]  ;;  %s539_s18 = scalar_lea.vmem [#allocation2], %s2832_s21  ;;  %s2756_s0 = scalar_lea.sflag [#allocation3], %s537_s20 }
  0x21   : > { %3266 = vmatpush3.bf16.msra.mxu1 %v3265_v12  ;;  %v2857_v4 = vld [vmem:[%s4079_s5 + $0x20] sm:$0xff]  ;;  %v2860_v8 = vld [vmem:[%s4079_s5 + $0x38] sm:$0xff]  ;;  %s2769_s26 = sshll.u32 %s539_s18, 4  ;;  %s3480_s28 = smov [#allocation2]   ;;  %s4033_s26 = int_to_ptr.vmem [resolvable:$true] %s2769_s26 }
  0x22   : > { %3260 = vmatpush3.bf16.msra.mxu0 %v3259_v13  ;;  %3071 = vmatprep.subr.mxu1 %v3478_v11  ;;  %v3286_v7 = vpack.c.bf16 %v2858_v5, %v2857_v4  ;;  %v3289_v9 = vpack.c.bf16 %v2860_v8, %v2859_v6  ;;  %v2882_v46 = vld [vmem:[%s4078_s4 + $0x2] ss:$0 sm:$0xff]  ;;  %s3412_s22 = scalar_lea.vmem %s4033_s26, 128  ;;  %s3416_s21 = sshll.u32 %s3480_s28, 4  ;;  %s3417_s21 = int_to_ptr.vmem [resolvable:$false] %s3416_s21 }
  0x23   : > { %3267 = vmatprep.subr.bf16.mxu0 %v3476_v3  ;;  %p3413_p11 = scmp.ne.s32.totalorder %s4033_s26, %s3412_s22  ;;  %s3418_s23 = scalar_lea.vmem %s3417_s21, 256 }
  0x24   : > { %3053 = vmatmul.mubr.msk.f32.vlgmr.msra.gmra.mrb[0].mxu1 %vm556_vm1, %v3662_v16  ;;  %p3419_p0 = scmp.lt.s32.totalorder %s4033_s26, %s3417_s21  ;;  %p3420_p1 = scmp.lt.s32.totalorder %s3418_s23, %s3412_s22 }
  0x25   : > { %3042 = vmatmul.mubr.msk.f32.vlgmr.msra.gmra.mrb[0].mxu0 %vm556_vm1, %v3662_v16  ;;  %3073 = vmatprep.mubr.msk.f32.mxu1 %vm3477_vm0, %v3478_v11  ;;  %p3414_p12 = pnand %p3413_p11, %p3609_p5 }
  0x26   : > { %3269 = vmatpush3.bf16.msra.mxu0 %v3268_v17  ;;  %3063 = vmatprep.mubr.msk.f32.mxu0 %vm3477_vm0, %v3478_v11  ;;  %p3421_p2 = por %p3420_p1, %p3419_p0 }
  0x27   : > { %3270 = vmatprep.subr.bf16.mxu0 %v3476_v3  ;;  %p3415_p13 = pneg %p3414_p12 }
  0x29   : > { %p3422_p3 = pnand %p3421_p2, %p3415_p13 }
  0x2a   : > { %3272 = vmatpush3.bf16.msra.mxu0 %v3271_v20 }
  0x2b   : > { %3066 = vmatprep.subr.mxu0 %v3478_v11 }
  0x2d   : > { %3064 = vmatmul.mubr.msk.f32.vlgmr.msra.gmra.mrb[2].mxu0 %vm556_vm1, %v3662_v16 }
  0x2e   : > { %3068 = vmatprep.mubr.msk.f32.mxu0 %vm3477_vm0, %v3478_v11 }
  0xf7   : > { %v707_v23 = vpop.f32.mrb[0].mxu1 }
  0xf8   : > { %v708_v24 = vadd.f32 %v2836_v21, %v707_v23  ;;  %v3054_v25 = vpop.f32.mrb[1].mxu1  ;;  %v626_v26 = vpop.f32.mrb[0].mxu0 }
  0xf9   : > { %v627_v27 = vadd.f32 %v2834_v22, %v626_v26  ;;  %v3043_v28 = vpop.f32.mrb[1].mxu0  ;;  %v2862_v22 = vld [vmem:[%s4080_s6 + $0x1] ss:$0 sm:$0xff]  ;;  %v2867_v25 = vld [vmem:[%s4081_s7 + $0x8] sm:$0xff] }
  0xfa   : > { %3067 = vmatpush3.xpose.msk.msra.mxu0 %vm792_vm2, %v708_v24 }
  0xfb   : > { %3273 = vmatprep.subr.bf16.mxu0 %v3476_v3 }
  0xfd   : > { %3069 = vmatmul.mubr.msk.f32.vlgmr.msra.gmra.mrb[4].mxu0 %vm792_vm2, %v627_v27 }
  0xfe   : > { %3084 = vmatprep.mubr.msk.f32.mxu0 %vm3477_vm0, %v3478_v11  ;;  %3275 = vmatpush3.bf16.msra.mxu0 %v3274_v44 }
  0xff   : > { %3276 = vmatprep.subr.bf16.mxu0 %v3476_v3 }
 0x100   : > { %v788_v30 = vpop.f32.mrb[2].mxu0 }
 0x101   : > { %v789_v31 = vadd.f32 %v2838_v29, %v788_v30  ;;  %v3065_v32 = vpop.f32.mrb[3].mxu0  ;;  %v954_v29 = vld [vmem:[%s4081_s7] sm:$0xff] }
 0x102   : > { %3278 = vmatpush3.bf16.msra.mxu0 %v3277_v47  ;;  %v2877_v30 = vld [vmem:[%s4109_s3 + $0x40] sm:$0xff] }
 0x103   : > { %3072 = vmatpush3.msra.mxu1 %v789_v31  ;;  %3285 = vmatprep.subr.bf16.mxu0 %v3476_v3  ;;  %v2878_v31 = vld [vmem:[%s4109_s3 + $0x48] sm:$0xff] }
 0x104   : > { %3279 = vmatprep.subr.bf16.mxu1 %v3476_v3  ;;  %v3298_v32 = vpack.c.bf16 %v2878_v31, %v2877_v30 }
 0x105   : > { %3085 = vmatmul.mubr.msk.f32.vlgmr.msra.gmra.mrb[6].mxu0 %vm556_vm1, %v3662_v16 }
 0x106   : > { %3106 = vmatprep.mubr.msk.f32.mxu0 %vm3477_vm0, %v3478_v11  ;;  %3287 = vmatpush3.bf16.msra.mxu0 %v3286_v7 }
 0x107   : > { %3288 = vmatprep.subr.bf16.mxu0 %v3476_v3 }
 0x10a   : > { %3290 = vmatpush3.bf16.msra.mxu0 %v3289_v9 }
 0x10b   : > { %3119 = vmatprep.subr.mxu0 %v3478_v11 }
 0x10d   : > { %3107 = vmatmul.mubr.msk.f32.vlgmr.msra.gmra.mrb[8].mxu0 %vm556_vm1, %v3662_v16 }
 0x10e   : > { %3121 = vmatprep.mubr.msk.f32.mxu0 %vm3477_vm0, %v3478_v11  ;;  %3120 = vmatpush3.msra.mxu0 %v2867_v25  ;;  %v2903_v25 = vld [vmem:[%s4109_s3 + $0x60] sm:$0xff] }
 0x10f   : > { %3291 = vmatprep.subr.bf16.mxu0 %v3476_v3 }
 0x1d0   : > { %v865_v33 = vpop.f32.mrb[4].mxu0 }
 0x1d1   : > { %v869_v34 = vmul.f32 0.35355338, %v865_v33  ;;  %v3070_v35 = vpop.f32.mrb[5].mxu0  ;;  %v2879_v33 = vld [vmem:[%s4109_s3 + $0x50] sm:$0xff] }
 0x1d3   : > { %v870_v36 = vsel %vm792_vm2, %v869_v34, -inf }
 0x1d4   : > { %871 = vmax.xlane.f32.xlu0 %v870_v36  ;;  %v2870_v36 = vld [vmem:[%s4110_s19 + $0x40] sm:$0xff] }
 0x1d8   : > { %v1034_v57 = vpop.f32.mrb[6].mxu0 }
 0x1d9   : > { %v3086_v58 = vpop.f32.mrb[7].mxu0  ;;  %v1035_v2 = vadd.f32 %v2848_v62, %v1034_v57  ;;  %v2884_v57 = vld [vmem:[%s4079_s5 + $0x40] sm:$0xff] }
 0x1da   : > { %v2885_v58 = vld [vmem:[%s4079_s5 + $0x48] sm:$0xff] }
 0x1e0   : > { %v1200_v21 = vpop.f32.mrb[8].mxu0 }
 0x1e1   : > { %v3108_v23 = vpop.f32.mrb[9].mxu0  ;;  %v1201_v24 = vadd.f32 %v2862_v22, %v1200_v21  ;;  %v2898_v22 = vld [vmem:[%s4110_s19 + $0x70] sm:$0xff] }
 0x1e2   : > { %v2899_v23 = vld [vmem:[%s4110_s19 + $0x78] sm:$0xff] }
 0x261   : > { %v872_v37 = vpop.xlane.xlu0 %871 }
 0x262   : > { %v873_v38 = vsub.f32 %v869_v34, %v872_v37  ;;  %v2880_v34 = vld [vmem:[%s4109_s3 + $0x58] sm:$0xff]  ;;  %v2871_v37 = vld [vmem:[%s4110_s19 + $0x48] sm:$0xff] }
 0x263   : > { %v3301_v35 = vpack.c.bf16 %v2880_v34, %v2879_v33 }
 0x264   : > { %v874_v39 = vmul.f32 1.442695, %v873_v38  ;;  %v3292_v38 = vpack.c.bf16 %v2871_v37, %v2870_v36 }
 0x266   : > { %3388 = vpow2.f32 %v874_v39  ;;  %v2872_v39 = vld [vmem:[%s4110_s19 + $0x50] sm:$0xff] }
 0x270   : > { %v3389_v40 = vpop.eup %3388 }
 0x271   : > { %v876_v41 = vsel %vm792_vm2, %v3389_v40, 0.0 }
 0x272   : > { %877 = vadd.xlane.f32.xlu0 %v876_v41 }
 0x2ff   : > { %v878_v48 = vpop.xlane.xlu0 %877 }
 0x300   : > { %3390 = vrcp.f32 %v878_v48 }
 0x30a   : > { %v3391_v51 = vpop.eup %3390 }
 0x30b   : > { %v880_v53 = vmul.f32 %v3391_v51, %v3389_v40  ;;  %v2873_v40 = vld [vmem:[%s4110_s19 + $0x58] sm:$0xff] }
 0x30c   : > { %v3295_v43 = vpack.c.bf16 %v2873_v40, %v2872_v39  ;;  %v2901_v39 = vld [vmem:[%s4112_s2 + $0x3] ss:$0 sm:$0xff] }
 0x30d   : > { %3074 = vmatmul.mubr.msk.f32.vlgmr.msra.gmra.mrb[2].mxu1 %vm792_vm2, %v880_v53  ;;  %v2875_v53 = vld [vmem:[%s4112_s2 + $0x2] ss:$0 sm:$0xff] }
 0x30e   : > { %3281 = vmatpush3.bf16.msra.mxu1 %v3280_v52  ;;  %3095 = vmatprep.mubr.msk.f32.mxu1 %vm3477_vm0, %v3478_v11 }
 0x30f   : > { %3282 = vmatprep.subr.bf16.mxu1 %v3476_v3 }
 0x312   : > { %3284 = vmatpush3.bf16.msra.mxu1 %v3283_v56 }
 0x313   : > { %3109 = vmatprep.subr.mxu1 %v3478_v11 }
 0x315   : > { %3096 = vmatmul.mubr.msk.f32.vlgmr.msra.gmra.mrb[4].mxu1 %vm556_vm1, %v3662_v16 }
 0x316   : > { %3111 = vmatprep.mubr.msk.f32.mxu1 %vm3477_vm0, %v3478_v11 }
 0x3e0   : > { %v950_v59 = vpop.f32.mrb[2].mxu1 }
 0x3e1   : > { %v3075_v60 = vpop.f32.mrb[3].mxu1 }
 0x3e2   : > { %v3304_v60 = vpack.c.bf16 %v2885_v58, %v2884_v57 }
 0x3e8   : > { %v1117_v63 = vpop.f32.mrb[4].mxu1 }
 0x3e9   : > { %v1118_v0 = vadd.f32 %v2855_v61, %v1117_v63  ;;  %v3097_v1 = vpop.f32.mrb[5].mxu1  ;;  %v2887_v61 = vld [vmem:[%s4079_s5 + $0x58] sm:$0xff] }
 0x3eb   : > { %3110 = vmatpush3.xpose.msk.msra.mxu1 %vm792_vm2, %v1118_v0 }
 0x3ec   : > { %3114 = vmatprep.subr.mxu1 %v3478_v11 }
 0x3ee   : > { %3112 = vmatmul.mubr.msk.f32.vlgmr.msra.gmra.mrb[6].mxu1 %vm792_vm2, %v1035_v2 }
 0x3ef   : > { %3116 = vmatprep.mubr.msk.f32.mxu1 %vm3477_vm0, %v3478_v11  ;;  %3115 = vmatpush3.msra.mxu1 %v1201_v24  ;;  %v3313_v24 = vpack.c.bf16 %v2899_v23, %v2898_v22  ;;  %v2527_v22 = vld [vmem:[%s4083_s9 + $0x18] sm:$0xff] }
 0x3f0   : > { %3124 = vmatprep.subr.mxu1 %v3478_v11 }
 0x4c1   : > { %v1276_v10 = vpop.f32.mrb[6].mxu1 }
 0x4c2   : > { %v1280_v12 = vmul.f32 0.35355338, %v1276_v10  ;;  %v3113_v13 = vpop.f32.mrb[7].mxu1  ;;  %v2889_v10 = vld [vmem:[%s4080_s6 + $0x2] ss:$0 sm:$0xff] }
 0x4c4   : > { %v1281_v14 = vsel %vm792_vm2, %v1280_v12, -inf }
 0x4c5   : > { %1282 = vmax.xlane.f32.xlu1 %v1281_v14  ;;  %v2894_v14 = vld [vmem:[%s4081_s7 + $0x10] sm:$0xff] }
 0x552   : > { %v1283_v15 = vpop.xlane.xlu1 %1282 }
 0x553   : > { %v1284_v17 = vsub.f32 %v1280_v12, %v1283_v15 }
 0x555   : > { %v1285_v18 = vmul.f32 1.442695, %v1284_v17 }
 0x557   : > { %3392 = vpow2.f32 %v1285_v18 }
 0x561   : > { %v3393_v19 = vpop.eup %3392 }
 0x562   : > { %v1287_v20 = vsel %vm792_vm2, %v3393_v19, 0.0 }
 0x563   : > { %1288 = vadd.xlane.f32.xlu1 %v1287_v20  ;;  %v2897_v20 = vld [vmem:[%s4110_s19 + $0x68] sm:$0xff] }
 0x5f0   : > { %v1289_v26 = vpop.xlane.xlu1 %1288 }
 0x5f1   : > { %3394 = vrcp.f32 %v1289_v26  ;;  %v2904_v26 = vld [vmem:[%s4109_s3 + $0x68] sm:$0xff] }
 0x5fb   : > { %v3395_v27 = vpop.eup %3394 }
 0x5fc   : > { %v1291_v28 = vmul.f32 %v3395_v27, %v3393_v19  ;;  %v2896_v19 = vld [vmem:[%s4110_s19 + $0x60] sm:$0xff]  ;;  %v3316_v27 = vpack.c.bf16 %v2904_v26, %v2903_v25 }
 0x5fd   : > { %v3310_v21 = vpack.c.bf16 %v2897_v20, %v2896_v19  ;;  %v2525_v20 = vld [vmem:[%s4083_s9 + $0x8] sm:$0xff] }
 0x5fe   : > { %3117 = vmatmul.mubr.msk.f32.vlgmr.msra.gmra.mrb[8].mxu1 %vm792_vm2, %v1291_v28  ;;  %v2905_v28 = vld [vmem:[%s4109_s3 + $0x70] sm:$0xff] }
 0x5ff   : > { %3125 = vmatpush3.msra.mxu1 %v954_v29  ;;  %3126 = vmatprep.mubr.msk.f32.mxu1 %vm3477_vm0, %v3478_v11  ;;  %v2906_v29 = vld [vmem:[%s4109_s3 + $0x78] sm:$0xff]  ;;  %s4031_s3 = scalar_lea.hbm %s4091_s17, %s2932_s30 }
 0x600   : > { %3297 = vmatprep.subr.bf16.mxu1 %v3476_v3 }
 0x602   : > { %3127 = vmatmul.mubr.msk.f32.vlgmr.msra.gmra.mrb[10].mxu1 %vm792_vm2, %v950_v59  ;;  %v2886_v59 = vld [vmem:[%s4079_s5 + $0x50] sm:$0xff] }
 0x603   : > { %3299 = vmatpush3.bf16.msra.mxu1 %v3298_v32  ;;  %3148 = vmatprep.mubr.msk.f32.mxu1 %vm3477_vm0, %v3478_v11  ;;  %v3307_v62 = vpack.c.bf16 %v2887_v61, %v2886_v59  ;;  %v3319_v32 = vpack.c.bf16 %v2906_v29, %v2905_v28  ;;  %v2923_v28 = vld [vmem:[%s4087_s13] ss:$0 sm:$0xff] }
 0x604   : > { %3300 = vmatprep.subr.bf16.mxu1 %v3476_v3 }
 0x607   : > { %3302 = vmatpush3.bf16.msra.mxu1 %v3301_v35 }
 0x608   : > { %3162 = vmatprep.subr.mxu1 %v3478_v11 }
 0x60a   : > { %3149 = vmatmul.mubr.msk.f32.vlgmr.msra.gmra.mrb[12].mxu1 %vm556_vm1, %v3662_v16 }
 0x60b   : > { %3164 = vmatprep.mubr.msk.f32.mxu1 %vm3477_vm0, %v3478_v11 }
 0x6d1   : > { %v1361_v41 = vpop.f32.mrb[8].mxu1 }
 0x6d2   : > { %v3118_v42 = vpop.f32.mrb[9].mxu1  ;;  %3122 = vmatmul.mubr.msk.f32.vlgmr.msra.gmra.mrb[10].mxu0 %vm792_vm2, %v1361_v41 }
 0x6d3   : > { %3293 = vmatpush3.bf16.msra.mxu0 %v3292_v38  ;;  %3137 = vmatprep.mubr.msk.f32.mxu0 %vm3477_vm0, %v3478_v11  ;;  %v2908_v38 = vld [vmem:[%s4078_s4 + $0x3] ss:$0 sm:$0xff] }
 0x6d4   : > { %3294 = vmatprep.subr.bf16.mxu0 %v3476_v3 }
 0x6d5   : > { %v1509_v44 = vpop.f32.mrb[10].mxu1 }
 0x6d6   : > { %v3128_v45 = vpop.f32.mrb[11].mxu1 }
 0x6d7   : > { %3296 = vmatpush3.bf16.msra.mxu0 %v3295_v43  ;;  %v2911_v45 = vld [vmem:[%s4079_s5 + $0x68] sm:$0xff] }
 0x6d8   : > { %3303 = vmatprep.subr.bf16.mxu0 %v3476_v3 }
 0x6da   : > { %3138 = vmatmul.mubr.msk.f32.vlgmr.msra.gmra.mrb[12].mxu0 %vm556_vm1, %v3662_v16 }
 0x6db   : > { %3159 = vmatprep.mubr.msk.f32.mxu0 %vm3477_vm0, %v3478_v11  ;;  %3305 = vmatpush3.bf16.msra.mxu0 %v3304_v60  ;;  %v2915_v60 = vld [vmem:[%s4080_s6 + $0x3] ss:$0 sm:$0xff] }
 0x6dc   : > { %3306 = vmatprep.subr.bf16.mxu0 %v3476_v3 }
 0x6dd   : > { %v1675_v47 = vpop.f32.mrb[12].mxu1 }
 0x6de   : > { %v1676_v48 = vadd.f32 %v2882_v46, %v1675_v47  ;;  %v3150_v49 = vpop.f32.mrb[13].mxu1  ;;  %v2912_v46 = vld [vmem:[%s4079_s5 + $0x70] sm:$0xff] }
 0x6df   : > { %3308 = vmatpush3.bf16.msra.mxu0 %v3307_v62 }
 0x6e0   : > { %3163 = vmatpush3.xpose.msk.msra.mxu1 %vm792_vm2, %v1676_v48  ;;  %3172 = vmatprep.subr.mxu0 %v3478_v11  ;;  %v2913_v48 = vld [vmem:[%s4079_s5 + $0x78] sm:$0xff] }
 0x6e1   : > { %3167 = vmatprep.subr.mxu1 %v3478_v11  ;;  %v3325_v49 = vpack.c.bf16 %v2913_v48, %v2912_v46 }
 0x6e2   : > { %3160 = vmatmul.mubr.msk.f32.vlgmr.msra.gmra.mrb[14].mxu0 %vm556_vm1, %v3662_v16 }
 0x6e3   : > { %3174 = vmatprep.mubr.msk.f32.mxu0 %vm3477_vm0, %v3478_v11  ;;  %3173 = vmatpush3.msra.mxu0 %v2894_v14 }
 0x6e4   : > { %3315 = vmatprep.subr.bf16.mxu0 %v3476_v3 }
 0x7a5   : > { %v1436_v50 = vpop.f32.mrb[10].mxu0 }
 0x7a6   : > { %v3835_v51 = vadd.f32 %v1509_v44, %v1436_v50  ;;  %v3123_v52 = vpop.f32.mrb[11].mxu0  ;;  %v2910_v44 = vld [vmem:[%s4079_s5 + $0x60] sm:$0xff] }
 0x7a7   : > { %v3322_v47 = vpack.c.bf16 %v2911_v45, %v2910_v44  ;;  %v2925_v45 = vld [vmem:[%s4084_s10] ss:$0 sm:$0xff] }
 0x7ad   : > { %v1592_v54 = vpop.f32.mrb[12].mxu0 }
 0x7ae   : > { %v1593_v55 = vadd.f32 %v2875_v53, %v1592_v54  ;;  %v3139_v56 = vpop.f32.mrb[13].mxu0 }
 0x7b0   : > { %3165 = vmatmul.mubr.msk.f32.vlgmr.msra.gmra.mrb[14].mxu1 %vm792_vm2, %v1593_v55 }
 0x7b1   : > { %3169 = vmatprep.mubr.msk.f32.mxu1 %vm3477_vm0, %v3478_v11 }
 0x7b5   : > { %v1758_v9 = vpop.f32.mrb[14].mxu0 }
 0x7b6   : > { %v3161_v12 = vpop.f32.mrb[15].mxu0  ;;  %v1759_v13 = vadd.f32 %v2889_v10, %v1758_v9 }
 0x7b8   : > { %3168 = vmatpush3.msra.mxu1 %v1759_v13 }
 0x7b9   : > { %3309 = vmatprep.subr.bf16.mxu1 %v3476_v3 }
 0x883   : > { %v1834_v63 = vpop.f32.mrb[14].mxu1 }
 0x884   : > { %v1838_v0 = vmul.f32 0.35355338, %v1834_v63  ;;  %v3166_v1 = vpop.f32.mrb[15].mxu1  ;;  %v2920_v63 = vld [vmem:[%s4081_s7 + $0x18] sm:$0xff] }
 0x886   : > { %v1839_v2 = vsel %vm792_vm2, %v1838_v0, -inf }
 0x887   : > { %1840 = vmax.xlane.f32.xlu0 %v1839_v2 }
 0x914   : > { %v1841_v4 = vpop.xlane.xlu0 %1840 }
 0x915   : > { %v1842_v5 = vsub.f32 %v1838_v0, %v1841_v4 }
 0x917   : > { %v1843_v6 = vmul.f32 1.442695, %v1842_v5 }
 0x919   : > { %3396 = vpow2.f32 %v1843_v6 }
 0x923   : > { %v3397_v7 = vpop.eup %3396 }
 0x924   : > { %v1845_v8 = vsel %vm792_vm2, %v3397_v7, 0.0 }
 0x925   : > { %1846 = vadd.xlane.f32.xlu1 %v1845_v8 }
 0x9b2   : > { %v1847_v15 = vpop.xlane.xlu1 %1846 }
 0x9b3   : > { %3398 = vrcp.f32 %v1847_v15 }
 0x9bd   : > { %v3399_v17 = vpop.eup %3398 }
 0x9be   : > { %v1849_v18 = vmul.f32 %v3399_v17, %v3397_v7  ;;  %v2922_v7 = vld [vmem:[%s4082_s8] ss:$0 sm:$0xff] }
 0x9c0   : > { %3170 = vmatmul.mubr.msk.f32.vlgmr.msra.gmra.mrb[16].mxu1 %vm792_vm2, %v1849_v18 }
 0x9c1   : > { %3185 = vmatprep.mubr.msk.f32.mxu1 %vm3477_vm0, %v3478_v11  ;;  %3311 = vmatpush3.bf16.msra.mxu1 %v3310_v21 }
 0x9c2   : > { %3312 = vmatprep.subr.bf16.mxu1 %v3476_v3 }
 0x9c5   : > { %3314 = vmatpush3.bf16.msra.mxu1 %v3313_v24 }
 0x9c6   : > { %3321 = vmatprep.subr.bf16.mxu1 %v3476_v3 }
 0x9c8   : > { %3186 = vmatmul.mubr.msk.f32.vlgmr.msra.gmra.mrb[18].mxu1 %vm556_vm1, %v3662_v16 }
 0x9c9   : > { %3207 = vmatprep.mubr.msk.f32.mxu1 %vm3477_vm0, %v3478_v11  ;;  %3323 = vmatpush3.bf16.msra.mxu1 %v3322_v47 }
 0x9ca   : > { %3324 = vmatprep.subr.bf16.mxu1 %v3476_v3 }
 0x9cd   : > { %3326 = vmatpush3.bf16.msra.mxu1 %v3325_v49 }
 0x9ce   : > { %3220 = vmatprep.subr.mxu1 %v3478_v11 }
 0x9d0   : > { %3208 = vmatmul.mubr.msk.f32.vlgmr.msra.gmra.mrb[20].mxu1 %vm556_vm1, %v3662_v16 }
 0x9d1   : > { %3222 = vmatprep.mubr.msk.f32.mxu1 %vm3477_vm0, %v3478_v11  ;;  %3221 = vmatpush3.msra.mxu1 %v2920_v63 }
 0x9d2   : > { %3333 = vmatprep.subr.bf16.mxu1 %v3476_v3 }
 0xa93   : > { %v1919_v30 = vpop.f32.mrb[16].mxu1 }
 0xa94   : > { %v3171_v31 = vpop.f32.mrb[17].mxu1  ;;  %3175 = vmatmul.mubr.msk.f32.vlgmr.msra.gmra.mrb[16].mxu0 %vm792_vm2, %v1919_v30  ;;  %v2924_v30 = vld [vmem:[%s4088_s14] ss:$0 sm:$0xff] }
 0xa95   : > { %3317 = vmatpush3.bf16.msra.mxu0 %v3316_v27  ;;  %3196 = vmatprep.mubr.msk.f32.mxu0 %vm3477_vm0, %v3478_v11 }
 0xa96   : > { %3318 = vmatprep.subr.bf16.mxu0 %v3476_v3 }
 0xa99   : > { %3320 = vmatpush3.bf16.msra.mxu0 %v3319_v32 }
 0xa9a   : > { %3210 = vmatprep.subr.mxu0 %v3478_v11 }
 0xa9b   : > { %v2078_v33 = vpop.f32.mrb[18].mxu1 }
 0xa9c   : > { %3197 = vmatmul.mubr.msk.f32.vlgmr.msra.gmra.mrb[18].mxu0 %vm556_vm1, %v3662_v16  ;;  %v3187_v34 = vpop.f32.mrb[19].mxu1  ;;  %v2079_v43 = vadd.f32 %v2901_v39, %v2078_v33  ;;  %v2635_v33 = vld [vmem:[%s4085_s11] sm:$0xff] }
 0xa9d   : > { %3212 = vmatprep.mubr.msk.f32.mxu0 %vm3477_vm0, %v3478_v11  ;;  %v2636_v34 = vld [vmem:[%s4085_s11 + $0x8] sm:$0xff]  ;;  %v2639_v39 = vld [vmem:[%s4085_s11 + $0x20] sm:$0xff] }
 0xaa3   : > { %v2244_v59 = vpop.f32.mrb[20].mxu1 }
 0xaa4   : > { %v3209_v61 = vpop.f32.mrb[21].mxu1  ;;  %v2245_v62 = vadd.f32 %v2915_v60, %v2244_v59 }
 0xb67   : > { %v1994_v35 = vpop.f32.mrb[16].mxu0 }
 0xb68   : > { %v1998_v36 = vadd.f32 %v1994_v35, %v3835_v51  ;;  %v3176_v37 = vpop.f32.mrb[17].mxu0  ;;  %v3334_v35 = vpack.c.bf16 %v2636_v34, %v2635_v33 }
 0xb69   : > { %v2638_v37 = vld [vmem:[%s4085_s11 + $0x18] sm:$0xff] }
 0xb6f   : > { %v2161_v40 = vpop.f32.mrb[18].mxu0 }
 0xb70   : > { %v2162_v41 = vadd.f32 %v2908_v38, %v2161_v40  ;;  %v3198_v42 = vpop.f32.mrb[19].mxu0  ;;  %v2640_v40 = vld [vmem:[%s4085_s11 + $0x28] sm:$0xff] }
 0xb71   : > { %v2641_v42 = vld [vmem:[%s4085_s11 + $0x30] sm:$0xff] }
 0xb72   : > { %3211 = vmatpush3.xpose.msk.msra.mxu0 %vm792_vm2, %v2162_v41  ;;  %v3340_v41 = vpack.c.bf16 %v2640_v40, %v2639_v39 }
 0xb73   : > { %3215 = vmatprep.subr.mxu0 %v3478_v11 }
 0xb75   : > { %3213 = vmatmul.mubr.msk.f32.vlgmr.msra.gmra.mrb[20].mxu0 %vm792_vm2, %v2079_v43  ;;  %v2642_v43 = vld [vmem:[%s4085_s11 + $0x38] sm:$0xff] }
 0xb76   : > { %3217 = vmatprep.mubr.msk.f32.mxu0 %vm3477_vm0, %v3478_v11  ;;  %3216 = vmatpush3.msra.mxu0 %v2245_v62  ;;  %v3343_v44 = vpack.c.bf16 %v2642_v43, %v2641_v42 }
 0xb77   : > { %3327 = vmatprep.subr.bf16.mxu0 %v3476_v3 }
 0xc48   : > { %v2320_v50 = vpop.f32.mrb[20].mxu0 }
 0xc49   : > { %v2324_v51 = vmul.f32 0.35355338, %v2320_v50  ;;  %v3214_v52 = vpop.f32.mrb[21].mxu0 }
 0xc4b   : > { %v2325_v53 = vsel %vm792_vm2, %v2324_v51, -inf }
 0xc4c   : > { %2326 = vmax.xlane.f32.xlu0 %v2325_v53 }
 0xcd9   : > { %v2327_v54 = vpop.xlane.xlu0 %2326 }
 0xcda   : > { %v2328_v55 = vsub.f32 %v2324_v51, %v2327_v54 }
 0xcdc   : > { %v2329_v56 = vmul.f32 1.442695, %v2328_v55 }
 0xcde   : > { %3400 = vpow2.f32 %v2329_v56 }
 0xce8   : > { %v3401_v57 = vpop.eup %3400 }
 0xce9   : > { %v2331_v58 = vsel %vm792_vm2, %v3401_v57, 0.0 }
 0xcea   : > { %2332 = vadd.xlane.f32.xlu1 %v2331_v58 }
 0xd77   : > { %v2333_v0 = vpop.xlane.xlu1 %2332 }
 0xd78   : > { %3402 = vrcp.f32 %v2333_v0 }
 0xd82   : > { %v3403_v1 = vpop.eup %3402 }
 0xd83   : > { %v2335_v2 = vmul.f32 %v3403_v1, %v3401_v57 }
 0xd85   : > { %3218 = vmatmul.mubr.msk.f32.vlgmr.msra.gmra.mrb[22].mxu0 %vm792_vm2, %v2335_v2 }
 0xd86   : > { %3233 = vmatprep.mubr.msk.f32.mxu0 %vm3477_vm0, %v3478_v11 }
 0xe58   : > { %v2405_v4 = vpop.f32.mrb[22].mxu0 }
 0xe59   : > { %v3219_v5 = vpop.f32.mrb[23].mxu0  ;;  %3223 = vmatmul.mubr.msk.f32.vlgmr.msra.gmra.mrb[22].mxu1 %vm792_vm2, %v2405_v4 }
 0xe5a   : > { %3252 = vmatprep.mubr.msk.f32.mxu1 %vm3477_vm0, %v3478_v11  ;;  %v2524_v11 = vld [vmem:[%s4083_s9] sm:$0xff]  ;;  %3335 = vmatpush3.bf16.msra.mxu1 %v3334_v35  ;;  %v3479_v5 = vmov -1.0  }
 0xe5b   : > { %v3328_v21 = vpack.c.bf16 %v2525_v20, %v2524_v11  ;;  %3336 = vmatprep.subr.bf16.mxu1 %v3476_v3 }
 0xe5d   : > { %3329 = vmatpush3.bf16.msra.mxu0 %v3328_v21 }
 0xe5e   : > { %3330 = vmatprep.subr.bf16.mxu0 %v3476_v3 }
 0xf2c   : > { %v2480_v6 = vpop.f32.mrb[22].mxu1 }
 0xf2d   : > { %v2484_v8 = vadd.f32 %v2480_v6, %v1998_v36  ;;  %v3224_v9 = vpop.f32.mrb[23].mxu1  ;;  %v2637_v36 = vld [vmem:[%s4085_s11 + $0x10] sm:$0xff] }
 0xf2e   : > { %v3337_v38 = vpack.c.bf16 %v2638_v37, %v2637_v36 }
 0xf2f   : > { %v2492_v10 = vadd.f32 %v2922_v7, %v2484_v8 }
 0xf30   : > { %3338 = vmatpush3.bf16.msra.mxu1 %v3337_v38 }
 0xf31   : > { %v2493_v12 = vadd.f32 %v2492_v10, %v3662_v16  ;;  %v2526_v16 = vld [vmem:[%s4083_s9 + $0x10] sm:$0xff]  ;;  %3339 = vmatprep.subr.bf16.mxu1 %v3476_v3 }
 0xf32   : > { %v3331_v23 = vpack.c.bf16 %v2527_v22, %v2526_v16 }
 0xf33   : > { %v2496_v13 = vsel %vm556_vm1, %v2493_v12, 0.0 }
 0xf34   : > { %2497 = vadd.xlane.f32.xlu0 %v2496_v13  ;;  %3332 = vmatpush3.bf16.msra.mxu0 %v3331_v23 }
 0xf35   : > { %3341 = vmatpush3.bf16.msra.mxu1 %v3340_v41 }
 0xf36   : > { %3342 = vmatprep.subr.bf16.mxu1 %v3476_v3 }
 0xf39   : > { %3344 = vmatpush3.bf16.msra.mxu1 %v3343_v44 }
 0xfc1   : > { %v2498_v14 = vpop.xlane.xlu0 %2497 }
 0xfc2   : > { %v2500_v15 = vmul.f32 0.03125, %v2498_v14 }
 0xfc4   : > { %v2501_v17 = vsub.f32 %v2493_v12, %v2500_v15  ;;  %v2927_v12 = vld [vmem:[%s4086_s12] ss:$0 sm:$0xff] }
 0xfc6   : > { %v2502_v18 = vmul.f32 %v2501_v17, %v2501_v17 }
 0xfc8   : > { %v2503_v19 = vsel %vm556_vm1, %v2502_v18, 0.0 }
 0xfc9   : > { %2504 = vadd.xlane.f32.xlu1 %v2503_v19 }
0x1056   : > { %v2505_v24 = vpop.xlane.xlu1 %2504 }
0x1057   : > { %v2506_v25 = vmul.f32 0.03125, %v2505_v24 }
0x1059   : > { %v2507_v26 = vadd.f32 1e-05, %v2506_v25 }
0x105b   : > { %3404 = vrsqrt.f32 %v2507_v26  ;;  %v2929_v26 = vld [vmem:[%s4089_s15] ss:$0 sm:$0xff] }
0x1065   : > { %v3405_v27 = vpop.eup %3404 }
0x1066   : > { %v2509_v29 = vmul.f32 %v3405_v27, %v2501_v17 }
0x1068   : > { %v2516_v31 = vmul.f32 %v2923_v28, %v2509_v29  ;;  %v2930_v28 = vld [vmem:[%s4090_s16] ss:$0 sm:$0xff] }
0x106a   : > { %v2523_v32 = vadd.f32 %v2924_v30, %v2516_v31 }
0x106c   : > { %3234 = vmatmul.mubr.msk.f32.vlgmr.msra.gmra.mrb[24].mxu0 %vm556_vm1, %v2523_v32 }
0x113f   : > { %v2604_v46 = vpop.f32.mrb[24].mxu0 }
0x1140   : > { %v2605_v47 = vadd.f32 %v2925_v45, %v2604_v46  ;;  %v3235_v48 = vpop.f32.mrb[25].mxu0 }
0x1142   : > { %v2609_v49 = vmul.f32 0.70710677, %v2605_v47  ;;  %v2608_v8 = vmul.f32 0.5, %v2605_v47 }
0x1144   : > { %v2612_v50 = vand.u32 2147483647, %v2609_v49  ;;  %vm2610_vm3 = vcmp.ge.f32.partialorder %v2609_v49, 0.0 }
0x1145   : > { %v2611_v6 = vsel %vm2610_vm3, 1.0, %v3479_v5 }
0x1146   : > { %v2613_v3 = vmul.f32 0.3275911, %v2612_v50  ;;  %v2626_v52 = vsub.f32 0.0, %v2612_v50 }
0x1148   : > { %v2614_v51 = vadd.f32 1.0, %v2613_v3  ;;  %v2627_v54 = vmul.f32 %v2626_v52, %v2612_v50 }
0x114a   : > { %3406 = vrcp.f32 %v2614_v51  ;;  %v2628_v57 = vmul.f32 1.442695, %v2627_v54 }
0x114c   : > { %3408 = vpow2.f32 %v2628_v57 }
0x1154   : > { %v3407_v53 = vpop.eup %3406 }
0x1155   : > { %v2617_v55 = vmul.f32 1.0614054, %v3407_v53 }
0x1156   : > { %v3409_v1 = vpop.eup %3408 }
0x1157   : > { %v2618_v56 = vadd.f32 -1.4531521, %v2617_v55 }
0x1159   : > { %v2619_v58 = vmul.f32 %v3407_v53, %v2618_v56 }
0x115b   : > { %v2620_v59 = vadd.f32 1.4214138, %v2619_v58 }
0x115d   : > { %v2621_v60 = vmul.f32 %v3407_v53, %v2620_v59 }
0x115f   : > { %v2622_v61 = vadd.f32 -0.28449672, %v2621_v60 }
0x1161   : > { %v2623_v62 = vmul.f32 %v3407_v53, %v2622_v61 }
0x1163   : > { %v2624_v63 = vadd.f32 0.2548296, %v2623_v62 }
0x1165   : > { %v2625_v0 = vmul.f32 %v3407_v53, %v2624_v63 }
0x1167   : > { %v2630_v2 = vmul.f32 %v3409_v1, %v2625_v0 }
0x1169   : > { %v2631_v4 = vsub.f32 1.0, %v2630_v2 }
0x116b   : > { %v2632_v7 = vmul.f32 %v2631_v4, %v2611_v6 }
0x116d   : > { %v2633_v9 = vadd.f32 1.0, %v2632_v7 }
0x116f   : > { %v2634_v10 = vmul.f32 %v2633_v9, %v2608_v8 }
0x1171   : > { %3253 = vmatmul.mubr.msk.f32.vlgmr.msra.gmra.mrb[24].mxu1 %vm2650_vm4, %v2634_v10 }
0x1244   : > { %v2720_v13 = vpop.f32.mrb[24].mxu1 }
0x1245   : > { %v2721_v14 = vadd.f32 %v2927_v12, %v2720_v13  ;;  %v3254_v15 = vpop.f32.mrb[25].mxu1 }
0x1247   : > { %v2724_v17 = vadd.f32 %v2721_v14, %v2523_v32 }
0x1249   : > { %v2727_v18 = vsel %vm556_vm1, %v2724_v17, 0.0 }
0x124a   : > { %2728 = vadd.xlane.f32.xlu0 %v2727_v18 }
0x12d7   : > { %v2729_v19 = vpop.xlane.xlu0 %2728 }
0x12d8   : > { %v2730_v11 = vmul.f32 0.03125, %v2729_v19 }
0x12da   : > { %v2731_v20 = vsub.f32 %v2724_v17, %v2730_v11 }
0x12dc   : > { %v2732_v21 = vmul.f32 %v2731_v20, %v2731_v20 }
0x12de   : > { %v2733_v16 = vsel %vm556_vm1, %v2732_v21, 0.0 }
0x12df   : > { %2734 = vadd.xlane.f32.xlu1 %v2733_v16 }
0x136c   : > { %v2735_v22 = vpop.xlane.xlu1 %2734 }
0x136d   : > { %v2736_v23 = vmul.f32 0.03125, %v2735_v22 }
0x136f   : > { %v2737_v24 = vadd.f32 1e-05, %v2736_v23 }
0x1371   : > { %3410 = vrsqrt.f32 %v2737_v24 }
0x137b   : > { %v3411_v25 = vpop.eup %3410 }
0x137c   : > { %v2739_v27 = vmul.f32 %v3411_v25, %v2731_v20 }
0x137e   : > { %v2746_v29 = vmul.f32 %v2929_v26, %v2739_v27 }
0x1380   : > { %v2753_v30 = vadd.f32 %v2930_v28, %v2746_v29 }
0x1382   : > { %2754 = vst.msk [vmem:[%s539_s18] sm:$0xff] %vm556_vm1, %v2753_v30 }
0x1383   : > { %3425 = shalt.err (!%p3422_p3)
}
0x1384   : > { %s3426_s2 = scalar_lea.hbm %s4031_s3, 128  ;;  %s3430_s30 = scalar_lea.hbm %s4091_s17, 256 }
0x1385   : > { %p3427_p4 = scmp.ne.s32.totalorder %s4031_s3, %s3426_s2  ;;  %p3431_p9 = scmp.lt.u32.totalorder %s4031_s3, %s4091_s17 }
0x1386   : > { %p3432_p10 = scmp.lt.u32.totalorder %s3430_s30, %s3426_s2  ;;  %p3434_p12 = scmp.lt.u32.totalorder %s3426_s2, %s4031_s3 }
0x1387   : > { %p3428_p7 = pnand %p3427_p4, %p3609_p5 }
0x1388   : > { %p3433_p11 = por %p3432_p10, %p3431_p9 }
0x1389   : > { %p3429_p8 = pneg %p3428_p7 }
0x138a   : > { %p3435_p13 = por %p3434_p12, %p3433_p11 }
0x138c   : > { %p3436_p0 = pnand %p3435_p13, %p3429_p8 }
0x138e   : > { %3439 = shalt.err (!%p3436_p0)
}
0x138f   : > { %3345 = dma.vmem_to_hbm [thread:$0]  (%p3609_p5), %s4033_s26, 128, %s4031_s3, %s2756_s0  }
0x1390 PF: > { %s4113_s22 = sld [smem:[#allocation5_spill]]  ;;  %p3351_p1 = scmp.ge.s32.totalorder %s3474_s27, 2 }
0x1392   : > { %p3348_p2 = pnand %p3351_p1, %p3613_p6 }
0x1396   : > { %s2781_s21 = sand.u32 1, %s4113_s22  }
0x1397   : > { %s2782_s23 = scalar_lea.sflag [#allocation3], %s2781_s21 }
0x1398   : > { %3457 = dma.done.wait (!%p3348_p2), %s2782_s23, 128  }
0x1399   : > { %3459 = vsyncadd (!%p3348_p2), %s2782_s23, 4294967168  ;;  %s4115_s27 = sld [smem:[#allocation7_spill]]  ;;  %s4116_s2 = sld [smem:[#allocation6_spill]] }
0x139a   : > { %s4117_s26 = sld [smem:[#allocation8_spill]]  ;;  %s4118_s24 = smov %s3466_s25 }
0x139f   : > { %p27_p3 = scmp.ge.s32.totalorder %s4115_s27, 4   ;;  %s4119_s25 = smov %s4116_s2 }
0x13a1   :  { %29 = sbr.rel (!%p27_p3) target bundleno = 8 (0x8), region = 144 }
0x13a8   :  { %2787 = vsyncpa [#allocation3], 1 }
0x13a9   :  { %2789 = vsyncpa [#allocation3 + $0x1], 1 }

</bundles_post_ra>
